<compile_context>
chip_gen: v7x
topology: tpu7x:2x2x1
jax: 0.10.0
libtpu: 0.0.40
codegen_flags: <defaults>
</compile_context>

<pallas_src>
import math

import jax
import jax.numpy as jnp
import numpy as np
from jax.experimental import pallas as pl
from jax.experimental.pallas import tpu as pltpu


def _nonlocal_kernel(x_ref, wt_ref, wp_ref, wc_ref, shift_ref, o_ref,
                     g_ref, phi_ref):
    # x_ref:     (1, C, HW)   f32   full image, channel-major (NCHW) layout
    # wt_ref:    (C, C//2)    bf16  theta weights, pre-scaled by 1/sqrt(C)
    # wp_ref:    (C, C//2)    bf16  phi weights
    # wc_ref:    (C, C)       f32   final 1x1 conv, BN scale folded in
    # shift_ref: (1, C)       f32   BN shift
    # o_ref:     (1, C, tq)   f32   output tile (channel-major layout)
    # g_ref:     (HW, C)      bf16  scratch: x in pixel-major layout (g values)
    # phi_ref:   (HW, C//2)   bf16  scratch: phi embedding of all pixels
    qi = pl.program_id(1)
    tq = o_ref.shape[2]

    # ---- once per image: pixel-major copy of x and the phi embedding -------
    @pl.when(qi == 0)
    def _():
        x_rows = jnp.transpose(x_ref[0])                       # (HW, C) f32
        xb = x_rows.astype(jnp.bfloat16)
        g_ref[...] = xb
        phi_ref[...] = jnp.dot(
            xb, wp_ref[...], preferred_element_type=jnp.float32
        ).astype(jnp.bfloat16)                                  # (HW, C//2)

    q0 = pl.multiple_of(qi * tq, tq)

    # ---- query tile (channel-major slice of the resident x block) ----------
    xc_tile = x_ref[0, :, pl.ds(q0, tq)]                        # (C, tq) f32
    xq = jnp.transpose(xc_tile).astype(jnp.bfloat16)            # (tq, C) bf16

    # theta embedding (1/sqrt(C) already folded into the weights)
    theta = jnp.dot(xq, wt_ref[...],
                    preferred_element_type=jnp.float32)         # (tq, C//2)
    theta = theta.astype(jnp.bfloat16)

    # scores[q, k] = sum_i theta[q, i] * phi[k, i]   (no explicit .T)
    scores = jax.lax.dot_general(
        theta, phi_ref[...], (((1,), (1,)), ((), ())),
        preferred_element_type=jnp.float32)                     # (tq, HW)

    # softmax pieces; normalization deferred until after the f@g matmul
    m = jnp.max(scores, axis=-1, keepdims=True)                 # (tq, 1)
    p = jnp.exp(scores - m)                                     # (tq, HW)
    l = jnp.sum(p, axis=-1, keepdims=True)                      # (tq, 1)

    y = jnp.dot(p.astype(jnp.bfloat16), g_ref[...],
                preferred_element_type=jnp.float32)             # (tq, C)
    y = y * pl.reciprocal(l, approx=True)                       # normalize here

    # final 1x1 conv (BN scale folded) + BN shift + residual
    z = jnp.dot(y, wc_ref[...], preferred_element_type=jnp.float32)  # (tq, C)
    z = z + shift_ref[...]                                      # (1, C) bcast

    o_ref[0] = (jnp.transpose(z) + xc_tile).astype(o_ref.dtype)  # (C, tq)


def _pick_tq(hw):
    # Largest query tile (multiple of 128) that divides HW and yields >= 2
    # tiles; otherwise fall back to a single tile over the whole image.
    for cand in (512, 256, 128):
        if hw % cand == 0 and hw // cand >= 2:
            return cand
    return hw


def nonlocal_forward(x_nchw, w_theta, w_phi, w_conv, gamma, beta, run_mean,
                     run_var, eps=1e-5):
    n, c, h, w = x_nchw.shape
    hw = h * w
    c2 = c // 2
    tq = _pick_tq(hw)
    nq = hw // tq

    # NCHW -> (N, C, HW) is a free reshape (no HBM transpose passes).
    x = x_nchw.reshape(n, c, hw).astype(jnp.float32)

    # conv weights (out, in, 1, 1) -> (in, out) so the kernel does x @ W.
    # Fold 1/sqrt(C) into theta; fold BN (eval) scale into the final conv.
    wt = (w_theta.reshape(c2, c).T / math.sqrt(c)).astype(jnp.bfloat16)  # (C, C//2)
    wp = w_phi.reshape(c2, c).T.astype(jnp.bfloat16)                     # (C, C//2)
    scale = gamma / jnp.sqrt(run_var + eps)
    shift = (beta - run_mean * scale).reshape(1, c).astype(jnp.float32)  # (1, C)
    wc = (w_conv.reshape(c, c).T * scale[None, :]).astype(jnp.float32)   # (C, C)

    # VMEM budget: double-buffered x / out blocks + scratch + score tile.
    vmem_bytes = (2 * c * hw * 4 + 2 * c * tq * 4          # pipelined blocks
                  + hw * c * 2 + hw * c2 * 2               # bf16 scratch
                  + tq * hw * (4 + 2)                      # scores f32 + p bf16
                  + (c * c + 2 * c * c2 + c) * 4)          # weights
    vmem_limit = int(min(max(2 * vmem_bytes, 32 * 1024 * 1024),
                         64 * 1024 * 1024))

    flops = 2 * n * (2 * hw * c * c2 + hw * hw * c2 + hw * hw * c + hw * c * c)
    cost = pl.CostEstimate(flops=flops,
                           transcendentals=n * hw * hw,
                           bytes_accessed=2 * n * c * hw * 4)

    out = pl.pallas_call(
        _nonlocal_kernel,
        out_shape=jax.ShapeDtypeStruct((n, c, hw), jnp.float32),
        grid_spec=pltpu.PrefetchScalarGridSpec(
            num_scalar_prefetch=0,
            grid=(n, nq),
            in_specs=[
                pl.BlockSpec((1, c, hw), lambda b, q: (b, 0, 0)),   # x (resident per image)
                pl.BlockSpec((c, c2), lambda b, q: (0, 0)),          # wt
                pl.BlockSpec((c, c2), lambda b, q: (0, 0)),          # wp
                pl.BlockSpec((c, c), lambda b, q: (0, 0)),           # wc (BN folded)
                pl.BlockSpec((1, c), lambda b, q: (0, 0)),           # BN shift
            ],
            out_specs=pl.BlockSpec((1, c, tq), lambda b, q: (b, 0, q)),
            scratch_shapes=[
                pltpu.VMEM((hw, c), jnp.bfloat16),    # g (pixel-major x)
                pltpu.VMEM((hw, c2), jnp.bfloat16),   # phi embedding
            ],
        ),
        compiler_params=pltpu.CompilerParams(
            # query axis carries per-image scratch -> "arbitrary";
            # batch axis "parallel" so v7x's 2 TensorCores split images.
            dimension_semantics=("parallel", "arbitrary"),
            vmem_limit_bytes=vmem_limit,
        ),
        cost_estimate=cost,
    )(x, wt, wp, wc, shift)

    # (N, C, HW) -> NCHW is a free reshape.
    return out.reshape(n, c, h, w)


def nonlocal_reference(x, w_theta, w_phi, w_conv, gamma, beta, mean, var, eps=1e-5):
    """Pure-JAX mirror of the PyTorch forward (embed=True, softmax=True, eval BN)."""
    n, c, h, w = x.shape
    theta = jnp.einsum("oc,nchw->nohw", w_theta.reshape(c // 2, c), x)
    phi = jnp.einsum("oc,nchw->nohw", w_phi.reshape(c // 2, c), x)
    g = x
    f = jnp.einsum("niab,nicd->nabcd", theta, phi)
    f = f.reshape(n, h * w, h * w) / jnp.sqrt(jnp.float32(c))
    f = jax.nn.softmax(f, axis=-1).reshape(n, h, w, h, w)
    f = jnp.einsum("nabcd,nicd->niab", f, g)
    f = jnp.einsum("oc,nchw->nohw", w_conv.reshape(c, c), f)
    f = (f - mean[None, :, None, None]) / jnp.sqrt(var + eps)[None, :, None, None]
    f = f * gamma[None, :, None, None] + beta[None, :, None, None]
    return f + x


if __name__ == "__main__":
    n, c, h, w = 2, 4, 16, 16

    key = jax.random.PRNGKey(0)
    kx, kt, kp, kc = jax.random.split(key, 4)

    x = jax.random.normal(kx, (n, c, h, w), dtype=jnp.float32)
    # conv weights, PyTorch shape (out, in, 1, 1); deterministic init
    w_theta = jax.random.normal(kt, (c // 2, c, 1, 1), dtype=jnp.float32) * 0.1
    w_phi = jax.random.normal(kp, (c // 2, c, 1, 1), dtype=jnp.float32) * 0.1
    w_conv = jax.random.normal(kc, (c, c, 1, 1), dtype=jnp.float32) * 0.1

    # BatchNorm2d default params / running stats (eval mode)
    gamma = jnp.ones((c,), jnp.float32)
    beta = jnp.zeros((c,), jnp.float32)
    run_mean = jnp.zeros((c,), jnp.float32)
    run_var = jnp.ones((c,), jnp.float32)

    out = nonlocal_forward(x, w_theta, w_phi, w_conv, gamma, beta, run_mean, run_var)
    out = jax.block_until_ready(out)

    ref = nonlocal_reference(x, w_theta, w_phi, w_conv, gamma, beta, run_mean, run_var)
    # bf16 MXU inputs -> loosen tolerance vs. the f32 reference.
    np.testing.assert_allclose(np.asarray(out), np.asarray(ref), rtol=2e-2, atol=2e-2)

    print("KERNEL_OK")
</pallas_src>

<mosaic_0001>
module attributes {stable_mosaic.version = 11 : i64} {
  func.func @_nonlocal_kernel(%arg0: i32, %arg1: i32, %arg2: memref<1x4x256xf32, #tpu.memory_space<vmem>>, %arg3: memref<4x2xbf16, #tpu.memory_space<vmem>>, %arg4: memref<4x2xbf16, #tpu.memory_space<vmem>>, %arg5: memref<4x4xf32, #tpu.memory_space<vmem>>, %arg6: memref<1x4xf32, #tpu.memory_space<vmem>>, %arg7: memref<1x4x128xf32, #tpu.memory_space<vmem>>, %arg8: memref<256x4xbf16, #tpu.memory_space<vmem>>, %arg9: memref<256x2xbf16, #tpu.memory_space<vmem>>) attributes {dimension_semantics = [#tpu.dimension_semantics<parallel>, #tpu.dimension_semantics<arbitrary>], iteration_bounds = array<i64: 2, 2>, scalar_prefetch = 0 : i64, scratch_operands = 2 : i64, tpu.core_type = #tpu.core_type<tc>, window_params = [{transform_indices = @transform_0, window_bounds = array<i64: 1, 4, 256>}, {pipeline_mode = #tpu.pipeline_mode<synchronous>, transform_indices = @transform_1, window_bounds = array<i64: 4, 2>}, {pipeline_mode = #tpu.pipeline_mode<synchronous>, transform_indices = @transform_2, window_bounds = array<i64: 4, 2>}, {pipeline_mode = #tpu.pipeline_mode<synchronous>, transform_indices = @transform_3, window_bounds = array<i64: 4, 4>}, {pipeline_mode = #tpu.pipeline_mode<synchronous>, transform_indices = @transform_4, window_bounds = array<i64: 1, 4>}, {transform_indices = @transform_5, window_bounds = array<i64: 1, 4, 128>}]} {
    %c0_i32 = arith.constant 0 : i32
    %0 = arith.cmpi eq, %arg1, %c0_i32 : i32
    %1 = arith.extui %0 : i1 to i32
    %c0_i32_0 = arith.constant 0 : i32
    %2 = arith.cmpi ne, %1, %c0_i32_0 : i32
    scf.if %2 {
      %c0_20 = arith.constant 0 : index
      %c0_21 = arith.constant 0 : index
      %c0_22 = arith.constant 0 : index
      %38 = vector.load %arg2[%c0_20, %c0_21, %c0_22] : memref<1x4x256xf32, #tpu.memory_space<vmem>>, vector<1x4x256xf32>
      %39 = vector.shape_cast %38 : vector<1x4x256xf32> to vector<4x256xf32>
      %40 = tpu.transpose %39, [1, 0] : vector<4x256xf32> -> vector<256x4xf32>
      %41 = arith.truncf %40 : vector<256x4xf32> to vector<256x4xbf16>
      %c0_23 = arith.constant 0 : index
      %c0_24 = arith.constant 0 : index
      %42 = vector.load %arg8[%c0_23, %c0_24] : memref<256x4xbf16, #tpu.memory_space<vmem>>, vector<256x4xbf16>
      tpu.vector_store %arg8[%c0_23, %c0_24], %41 {strides = array<i32>} : memref<256x4xbf16, #tpu.memory_space<vmem>>, vector<256x4xbf16>,
      %c0_25 = arith.constant 0 : index
      %c0_26 = arith.constant 0 : index
      %43 = vector.load %arg4[%c0_25, %c0_26] : memref<4x2xbf16, #tpu.memory_space<vmem>>, vector<4x2xbf16>
      %cst_27 = arith.constant dense<0.000000e+00> : vector<256x2xf32>
      %44 = tpu.matmul %41, %43, %cst_27 {dimension_numbers = #tpu.dot_dimension_numbers<[1], [0], [0], [1], [0, 0, 1, 1], [], []>} : vector<256x4xbf16>, vector<4x2xbf16>, vector<256x2xf32> -> vector<256x2xf32>
      %45 = arith.truncf %44 : vector<256x2xf32> to vector<256x2xbf16>
      %c0_28 = arith.constant 0 : index
      %c0_29 = arith.constant 0 : index
      %46 = vector.load %arg9[%c0_28, %c0_29] : memref<256x2xbf16, #tpu.memory_space<vmem>>, vector<256x2xbf16>
      tpu.vector_store %arg9[%c0_28, %c0_29], %45 {strides = array<i32>} : memref<256x2xbf16, #tpu.memory_space<vmem>>, vector<256x2xbf16>,
    } else {
    }
    %c128_i32 = arith.constant 128 : i32
    %3 = arith.muli %arg1, %c128_i32 : i32
    %4 = tpu.assume_multiple %3, 128 : i32
    %c0 = arith.constant 0 : index
    %c0_1 = arith.constant 0 : index
    %5 = arith.index_cast %4 : i32 to index
    %6 = vector.load %arg2[%c0, %c0_1, %5] : memref<1x4x256xf32, #tpu.memory_space<vmem>>, vector<1x4x128xf32>
    %7 = vector.shape_cast %6 : vector<1x4x128xf32> to vector<4x128xf32>
    %8 = tpu.transpose %7, [1, 0] : vector<4x128xf32> -> vector<128x4xf32>
    %9 = arith.truncf %8 : vector<128x4xf32> to vector<128x4xbf16>
    %c0_2 = arith.constant 0 : index
    %c0_3 = arith.constant 0 : index
    %10 = vector.load %arg3[%c0_2, %c0_3] : memref<4x2xbf16, #tpu.memory_space<vmem>>, vector<4x2xbf16>
    %cst = arith.constant dense<0.000000e+00> : vector<128x2xf32>
    %11 = tpu.matmul %9, %10, %cst {dimension_numbers = #tpu.dot_dimension_numbers<[1], [0], [0], [1], [0, 0, 1, 1], [], []>} : vector<128x4xbf16>, vector<4x2xbf16>, vector<128x2xf32> -> vector<128x2xf32>
    %12 = arith.truncf %11 : vector<128x2xf32> to vector<128x2xbf16>
    %c0_4 = arith.constant 0 : index
    %c0_5 = arith.constant 0 : index
    %13 = vector.load %arg9[%c0_4, %c0_5] : memref<256x2xbf16, #tpu.memory_space<vmem>>, vector<256x2xbf16>
    %cst_6 = arith.constant dense<0.000000e+00> : vector<128x256xf32>
    %14 = tpu.matmul %12, %13, %cst_6 {dimension_numbers = #tpu.dot_dimension_numbers<[1], [1], [0], [0], [0, 0, 1, 0], [], []>} : vector<128x2xbf16>, vector<256x2xbf16>, vector<128x256xf32> -> vector<128x256xf32>
    %cst_7 = arith.constant dense<0xFF800000> : vector<128xf32>
    %15 = vector.multi_reduction <maximumf>, %14, %cst_7 [1] : vector<128x256xf32> to vector<128xf32>
    %16 = vector.shape_cast %15 : vector<128xf32> to vector<128x1xf32>
    %17 = vector.broadcast %16 : vector<128x1xf32> to vector<128x256xf32>
    %18 = arith.subf %14, %17 : vector<128x256xf32>
    %19 = math.exp %18 : vector<128x256xf32>
    %cst_8 = arith.constant dense<0.000000e+00> : vector<128xf32>
    %20 = vector.multi_reduction <add>, %19, %cst_8 [1] : vector<128x256xf32> to vector<128xf32>
    %21 = vector.shape_cast %20 : vector<128xf32> to vector<128x1xf32>
    %22 = arith.truncf %19 : vector<128x256xf32> to vector<128x256xbf16>
    %c0_9 = arith.constant 0 : index
    %c0_10 = arith.constant 0 : index
    %23 = vector.load %arg8[%c0_9, %c0_10] : memref<256x4xbf16, #tpu.memory_space<vmem>>, vector<256x4xbf16>
    %cst_11 = arith.constant dense<0.000000e+00> : vector<128x4xf32>
    %24 = tpu.matmul %22, %23, %cst_11 {dimension_numbers = #tpu.dot_dimension_numbers<[1], [0], [0], [1], [0, 0, 1, 1], [], []>} : vector<128x256xbf16>, vector<256x4xbf16>, vector<128x4xf32> -> vector<128x4xf32>
    %25 = tpu.reciprocal %21 {approx = true} : vector<128x1xf32> -> vector<128x1xf32>
    %26 = vector.broadcast %25 : vector<128x1xf32> to vector<128x4xf32>
    %27 = arith.mulf %24, %26 : vector<128x4xf32>
    %c0_12 = arith.constant 0 : index
    %c0_13 = arith.constant 0 : index
    %28 = vector.load %arg5[%c0_12, %c0_13] : memref<4x4xf32, #tpu.memory_space<vmem>>, vector<4x4xf32>
    %cst_14 = arith.constant dense<0.000000e+00> : vector<128x4xf32>
    %29 = tpu.matmul %27, %28, %cst_14 {dimension_numbers = #tpu.dot_dimension_numbers<[1], [0], [0], [1], [0, 0, 1, 1], [], []>} : vector<128x4xf32>, vector<4x4xf32>, vector<128x4xf32> -> vector<128x4xf32>
    %c0_15 = arith.constant 0 : index
    %c0_16 = arith.constant 0 : index
    %30 = vector.load %arg6[%c0_15, %c0_16] : memref<1x4xf32, #tpu.memory_space<vmem>>, vector<1x4xf32>
    %31 = vector.broadcast %30 : vector<1x4xf32> to vector<128x4xf32>
    %32 = arith.addf %29, %31 : vector<128x4xf32>
    %33 = tpu.transpose %32, [1, 0] : vector<128x4xf32> -> vector<4x128xf32>
    %34 = arith.addf %33, %7 : vector<4x128xf32>
    %c0_17 = arith.constant 0 : index
    %c0_18 = arith.constant 0 : index
    %c0_19 = arith.constant 0 : index
    %35 = vector.load %arg7[%c0_17, %c0_18, %c0_19] : memref<1x4x128xf32, #tpu.memory_space<vmem>>, vector<1x4x128xf32>
    %36 = vector.shape_cast %35 : vector<1x4x128xf32> to vector<4x128xf32>
    %37 = vector.shape_cast %34 : vector<4x128xf32> to vector<1x4x128xf32>
    tpu.vector_store %arg7[%c0_17, %c0_18, %c0_19], %37 {strides = array<i32>} : memref<1x4x128xf32, #tpu.memory_space<vmem>>, vector<1x4x128xf32>,
    return
  }
  func.func @transform_0(%arg0: i32, %arg1: i32) -> (i32, i32, i32) {
    %c0_i32 = arith.constant 0 : i32
    %c0_i32_0 = arith.constant 0 : i32
    %c0_i32_1 = arith.constant 0 : i32
    return %arg0, %c0_i32, %c0_i32_0 : i32, i32, i32
  }
  func.func @transform_1(%arg0: i32, %arg1: i32) -> (i32, i32) {
    %c0_i32 = arith.constant 0 : i32
    %c0_i32_0 = arith.constant 0 : i32
    %c0_i32_1 = arith.constant 0 : i32
    return %c0_i32, %c0_i32_0 : i32, i32
  }
  func.func @transform_2(%arg0: i32, %arg1: i32) -> (i32, i32) {
    %c0_i32 = arith.constant 0 : i32
    %c0_i32_0 = arith.constant 0 : i32
    %c0_i32_1 = arith.constant 0 : i32
    return %c0_i32, %c0_i32_0 : i32, i32
  }
  func.func @transform_3(%arg0: i32, %arg1: i32) -> (i32, i32) {
    %c0_i32 = arith.constant 0 : i32
    %c0_i32_0 = arith.constant 0 : i32
    %c0_i32_1 = arith.constant 0 : i32
    return %c0_i32, %c0_i32_0 : i32, i32
  }
  func.func @transform_4(%arg0: i32, %arg1: i32) -> (i32, i32) {
    %c0_i32 = arith.constant 0 : i32
    %c0_i32_0 = arith.constant 0 : i32
    %c0_i32_1 = arith.constant 0 : i32
    return %c0_i32, %c0_i32_0 : i32, i32
  }
  func.func @transform_5(%arg0: i32, %arg1: i32) -> (i32, i32, i32) {
    %c0_i32 = arith.constant 0 : i32
    %c0_i32_0 = arith.constant 0 : i32
    return %arg0, %c0_i32, %arg1 : i32, i32, i32
  }
}

</mosaic_0001>

<bundles_post_ra>
// kernel: tpu_custom_call.1
= control target key start
LH: loop header
LB: loop body
LE: loop exit
PB: predicated region body
PF: predicated region fallthrough
CT: control target
= control target key end

     0   :  { %10 = vsyncpa [#allocation5], 0  ;;  %s2939_s0 = inlined_call_operand.hbm [shape: f32[2,4,256], index: 0, kind: input, shape index: {}]   ;;  %s2940_s1 = inlined_call_operand.vmem [shape: bf16[4,2], index: 1, kind: input, shape index: {}]   ;;  %s2941_s2 = inlined_call_operand.vmem [shape: bf16[4,2], index: 2, kind: input, shape index: {}]   ;;  %s2942_s3 = inlined_call_operand.vmem [shape: f32[4,4], index: 3, kind: input, shape index: {}]   ;;  %s2943_s4 = inlined_call_operand.vmem [shape: f32[1,4], index: 4, kind: input, shape index: {}]   ;;  %s2944_s5 = inlined_call_operand.hbm [shape: f32[2,4,256], index: 5, kind: output, shape index: {}]  }
   0x1   :  { %12 = vsyncpa [#allocation5 + $0x1], 0 }
   0x2   :  { %13 = vsyncpa [#allocation6], 0 }
   0x3   :  { %15 = vsyncpa [#allocation6 + $0x1], 0  ;;  %s2453_s18 = smov 0   ;;  %s2455_s19 = smov 0  }
   0x4   :  { %s2457_s20 = smov 0   ;;  %s2459_s21 = smov 0  }
   0x5   :  { %s2461_s22 = smov 0   ;;  %s2463_s23 = smov 0  }
   0x6   :  { %s2465_s24 = smov 0   ;;  %s2467_s25 = smov 0  }
   0x7   :  { %s2469_s26 = smov 0   ;;  %s2471_s27 = smov 0  }
   0x8   :  { %s2473_s28 = smov 0  }
   0x9 LB: > { %2949 = sst [smem:[#allocation10_spill]] %s2415_s27  ;;  %s1684_s29 = sadd.s32 4294967295, %s2419_s28   ;;  %s2419_s28 = sphi %s2473_s28, %s21_s28   ;;  %s2415_s27 = sphi %s2471_s27, %s2963_s27   ;;  %s2411_s26 = sphi %s2469_s26, %s2971_s26   ;;  %s2407_s25 = sphi %s2467_s25, %s2961_s25   ;;  %s2403_s24 = sphi %s2465_s24, %s2970_s24   ;;  %s2399_s23 = sphi %s2463_s23, %s2969_s23   ;;  %s2395_s22 = sphi %s2461_s22, %s2968_s22   ;;  %s2391_s21 = sphi %s2459_s21, %s2967_s21   ;;  %s2387_s20 = sphi %s2457_s20, %s2966_s20   ;;  %s2383_s19 = sphi %s2455_s19, %s2965_s19   ;;  %s2379_s18 = sphi %s2453_s18, %s2964_s18  }
   0xa   : > { %s1685_s30 = sadd.s32 4294967294, %s2419_s28   ;;  %s30_s6 = sadd.s32 1, %s2411_s26 }
   0xb   : > { %s33_s7 = sadd.s32 1, %s2415_s27  ;;  %p31_p0 = scmp.ge.s32.totalorder %s30_s6, 2 }
   0xc   : > { %s40_s8 = sadd.s32 1, %s2399_s23  ;;  %p47_p1 = scmp.ne.s32.totalorder %s2399_s23, %s2395_s22 }
   0xd   : > { %p48_p2 = scmp.eq.s32.totalorder %s2419_s28, 0  ;;  %s2973_s6 = smov (%p31_p0, %s30_s6), 0 }
   0xe   : > { %2950 = sst [smem:[#allocation11_spill]] %s2973_s6  ;;  %s2975_s7 = smov (!%p31_p0, %s33_s7), %s2415_s27 }
   0xf   : > { %p2517_p3 = por %p48_p2, %p47_p1  ;;  %p53_p4 = scmp.ne.s32.totalorder %s2395_s22, %s2391_s21 }
  0x10   : > { %p35_p5 = scmp.ge.s32.totalorder %s2975_s7, 2  ;;  %p54_p6 = scmp.eq.s32.totalorder %s1684_s29, 0 }
  0x11   : > { %s148_s10 = ssub.s32 %s2411_s26, %s2973_s6  ;;  %s152_s11 = sadd.s32 1, %s2387_s20 }
  0x12   : > { %s2977_s7 = smov (%p35_p5, %s2975_s7), 0  ;;  %p2527_p7 = por %p54_p6, %p53_p4 }
  0x13   : > { %2952 = sst [smem:[#allocation12_spill]] %s2977_s7  ;;  %p162_p8 = scmp.ne.s32.totalorder %s2387_s20, %s2383_s19 }
  0x14   : > { %s37_s13 = ssub.s32 %s2415_s27, %s2977_s7  ;;  %p163_p9 = scmp.eq.s32.totalorder %s1684_s29, 3 }
  0x15   : > { %p38_p10 = scmp.eq.s32.totalorder %s37_s13, 0  ;;  %s149_s14 = sor.u32 %s148_s10, %s37_s13 }
  0x16   : > { %p150_p11 = scmp.eq.s32.totalorder %s149_s14, 0  ;;  %p2535_p12 = por %p163_p9, %p162_p8 }
  0x17   : > { %s2540_s16 = scalar_select %p38_p10, %s2399_s23, %s40_s8  }
  0x18   : > { %s2954_s15 = scalar_select %p2535_p12, 1, 0 }
  0x19   : > { %s2543_s17 = scalar_select %p150_p11, %s2387_s20, %s152_s11  }
  0x1a   : > { %p168_p13 = scmp.ne.s32.totalorder %s2383_s19, %s2379_s18  ;;  %p169_p0 = scmp.eq.s32.totalorder %s1685_s30, 3 }
  0x1b   : > { %p1995_p1 = scmp.lt.s32.totalorder %s2419_s28, 4  ;;  %s201_s29 = sand.u32 1, %s2399_s23  }
  0x1c   : > { %p2548_p2 = por %p169_p0, %p168_p13  ;;  %s1688_s10 = sshll.u32 %s201_s29, 3 }
  0x1d   : > { %s1752_s13 = sshll.u32 %s2415_s27, 7  ;;  %s205_s8 = scalar_lea.vmem [#allocation4], %s1688_s10 }
  0x1e   : > { %s2955_s21 = scalar_select %p2548_p2, 1, 0 }
  0x1f   : > { %s2557_s6 = scalar_lea.hbm %s2939_s0, %s1752_s13  ;;  %s213_s11 = sshll.u32 %s205_s8, 4  ;;  %s2559_s11 = int_to_ptr.vmem [resolvable:$true] %s213_s11 }
  0x20   : > { %p2563_p4 = pnand %p1995_p1, %p2517_p3  ;;  %s202_s7 = scalar_lea.sflag [#allocation5], %s201_s29 }
  0x21   : > { %s2267_s13 = scalar_lea.hbm %s2557_s6, 128  ;;  %s2272_s9 = scalar_lea.hbm %s2939_s0, 256 }
  0x22   : > { %p2268_p8 = scmp.ne.s32.totalorder %s2557_s6, %s2267_s13  ;;  %p2269_p9 = pneg %p2563_p4 }
  0x23   : > { %p2273_p3 = scmp.lt.u32.totalorder %s2557_s6, %s2939_s0  ;;  %p2274_p13 = scmp.lt.u32.totalorder %s2272_s9, %s2267_s13 }
  0x24   : > { %p2270_p10 = pnand %p2269_p9, %p2268_p8  ;;  %p2276_p1 = scmp.lt.u32.totalorder %s2267_s13, %s2557_s6 }
  0x25   : > { %p2275_p0 = por %p2274_p13, %p2273_p3 }
  0x26   : > { %p2271_p11 = pneg %p2270_p10 }
  0x27   : > { %p2277_p5 = por %p2276_p1, %p2275_p0 }
  0x29   : > { %p2278_p6 = pnand %p2277_p5, %p2271_p11 }
  0x2b   : > { %2281 = shalt.err (!%p2278_p6)
}
  0x2c   : > { %s2282_s29 = scalar_lea.vmem %s2559_s11, 128  ;;  %s2421_s10 = smov [#allocation4]  }
  0x2d   : > { %p2283_p8 = scmp.ne.s32.totalorder %s2559_s11, %s2282_s29  ;;  %s2287_s14 = sshll.u32 %s2421_s10, 4  ;;  %s2288_s14 = int_to_ptr.vmem [resolvable:$false] %s2287_s14 }
  0x2e   : > { %s2289_s27 = scalar_lea.vmem %s2288_s14, 256  ;;  %p2290_p12 = scmp.lt.s32.totalorder %s2559_s11, %s2288_s14 }
  0x2f   : > { %p2285_p10 = pnand %p2283_p8, %p2269_p9  ;;  %p2291_p3 = scmp.lt.s32.totalorder %s2289_s27, %s2282_s29 }
  0x31   : > { %p2286_p2 = pneg %p2285_p10  ;;  %p2292_p13 = por %p2291_p3, %p2290_p12 }
  0x33   : > { %p2293_p0 = pnand %p2292_p13, %p2286_p2 }
  0x35   : > { %2296 = shalt.err (!%p2293_p0)
}
  0x36   : > { %1990 = dma.hbm_to_vmem [thread:$0]  (!%p2563_p4), %s2557_s6, 128, %s2559_s11, %s202_s7  }
  0x37   : > { %p2957_p5 = scmp.lt.s32.totalorder %s2419_s28, 5  ;;  %p2958_p6 = scmp.ge.s32.totalorder %s2419_s28, 1 }
  0x39   : > { %p219_p9 = pnand %p2958_p6, %p2957_p5 }
  0x3a   : > { %s224_s13 = sand.u32 (!%p219_p9), 1, %s2395_s22  }
  0x3b   : > { %222 = sbr.rel (%p219_p9) target bundleno = 1809 (0x711), region = 40  ;;  %s2599_s9 = sshll.u32 (!%p219_p9), %s224_s13, 3 }
  0x3c   : > { %s225_s8 = scalar_lea.sflag (!%p219_p9), [#allocation5], %s224_s13  ;;  %s228_s29 = scalar_lea.vmem (!%p219_p9), [#allocation4], %s2599_s9 }
  0x42   : > { %2370 = dma.done.wait (%p2527_p7), %s225_s8, 128  }
  0x43   : > { %2372 = vsyncadd (%p2527_p7), %s225_s8, 4294967168  ;;  %s252_s6 = sand.u32 1, %s2383_s19   ;;  %p1694_p12 = scmp.ne.s32.totalorder %s2403_s24, 0 }
  0x44   : > { %s2609_s11 = sshll.u32 %s252_s6, 2  ;;  %v260_v0 = vld [vmem:[%s228_s29] sm:$0xff] (!%p1694_p12)  ;;  %vm410_vm0 = vcmask (!%p1694_p12), 1041408   ;;  %vm344_vm1 = vcmask (!%p1694_p12), 31744   ;;  %vm591_vm2 = vcmask (!%p1694_p12), 15360  }
  0x45   : > { %s254_s30 = scalar_lea.vmem [#allocation7], %s2609_s11  ;;  %259 = sbr.rel (%p1694_p12) target bundleno = 484 (0x1e4), region = 48  ;;  %v262_v1 = vcombine.high (!%p1694_p12), %v260_v0, %v260_v0  ;;  %v361_v3 = vld [vmem:[%s2941_s2] sm:$0x3] (!%p1694_p12) }
  0x46   : > { %1972 = vmatprep.subr.msk.bf16.mxu0 (!%p1694_p12), %vm410_vm0, %v361_v3  ;;  %1973 = vmatprep.subr.msk.bf16.mxu1 (!%p1694_p12), %vm410_vm0, %v361_v3  ;;  %v412_v4 = vsel (!%p1694_p12), %vm410_vm0, %v361_v3, 0 }
  0x47   : > { %v2087_v2 = vpack.i.bf16 (!%p1694_p12), %v262_v1, %v260_v0  ;;  %1893 = vmatpush3.bf16.msra.mxu0 (!%p1694_p12), %v412_v4  ;;  %1971 = vmatpush3.bf16.msra.mxu1 (!%p1694_p12), %v412_v4 }
  0x49   : > { %2088 = vxpose.xlu0.b32.start.end [1/1] (short) (!%p1694_p12), %v2087_v2, 128 }
  0xc9   : > { %v2089_v5 = vpop.trf.xlu0 }
  0xca   : > { %v2090_v7 = vunpack.i.l.bf16 %v2089_v5  ;;  %v2093_v8 = vunpack.i.h.bf16 %v2089_v5 }
  0xcd   : > { %v2094_v6 = vpop.trf.xlu0 }
  0xce   : > { %v2095_v9 = vunpack.i.l.bf16 %v2094_v6  ;;  %v2098_v10 = vunpack.i.h.bf16 %v2094_v6 }
  0xd0   : > { %v328_v11 = vpack.c.bf16 %v2095_v9, %v2090_v7  ;;  %v336_v12 = vpack.c.bf16 %v2098_v10, %v2093_v8 }
  0xd1   : > { %v2099_v13 = vpop.trf.xlu0 }
  0xd2   : > { %345 = vst.msk [vmem:[#allocation2] sm:$0xff] %vm344_vm1, %v328_v11  ;;  %1894 = vmatprep.mubr.msk.bf16.mxu0 %vm344_vm1, %v328_v11  ;;  %353 = vst.msk [vmem:[#allocation2 + $0x40] sm:$0xff] %vm344_vm1, %v336_v12  ;;  %1910 = vmatprep.mubr.msk.bf16.mxu1 %vm344_vm1, %v336_v12  ;;  %v2103_v14 = vunpack.i.h.bf16 %v2099_v13  ;;  %v2100_v15 = vunpack.i.l.bf16 %v2099_v13 }
  0xd5   : > { %v2104_v16 = vpop.trf.xlu0 }
  0xd6   : > { %v2108_v17 = vunpack.i.h.bf16 %v2104_v16  ;;  %v2105_v18 = vunpack.i.l.bf16 %v2104_v16 }
  0xd8   : > { %v329_v19 = vpack.c.bf16 %v2105_v18, %v2100_v15  ;;  %v337_v20 = vpack.c.bf16 %v2108_v17, %v2103_v14 }
  0xd9   : > { %v2109_v21 = vpop.trf.xlu0 }
  0xda   : > { %346 = vst.msk [vmem:[#allocation2 + $0x8] sm:$0xff] %vm344_vm1, %v329_v19  ;;  %1895 = vmatmul.mubr.msk.bf16.vlgmr.msra.gmra.mrb[0].mxu0 %vm344_vm1, %v329_v19  ;;  %354 = vst.msk [vmem:[#allocation2 + $0x48] sm:$0xff] %vm344_vm1, %v337_v20  ;;  %1911 = vmatmul.mubr.msk.bf16.vlgmr.msra.gmra.mrb[0].mxu1 %vm344_vm1, %v337_v20  ;;  %v2113_v22 = vunpack.i.h.bf16 %v2109_v21  ;;  %v2110_v23 = vunpack.i.l.bf16 %v2109_v21 }
  0xdd   : > { %v2114_v24 = vpop.trf.xlu0 }
  0xde   : > { %v2118_v25 = vunpack.i.h.bf16 %v2114_v24  ;;  %v2115_v26 = vunpack.i.l.bf16 %v2114_v24 }
  0xe0   : > { %v330_v27 = vpack.c.bf16 %v2115_v26, %v2110_v23  ;;  %v338_v28 = vpack.c.bf16 %v2118_v25, %v2113_v22 }
  0xe1   : > { %v2119_v29 = vpop.trf.xlu0 }
  0xe2   : > { %347 = vst.msk [vmem:[#allocation2 + $0x10] sm:$0xff] %vm344_vm1, %v330_v27  ;;  %1898 = vmatprep.mubr.msk.bf16.mxu0 %vm344_vm1, %v330_v27  ;;  %355 = vst.msk [vmem:[#allocation2 + $0x50] sm:$0xff] %vm344_vm1, %v338_v28  ;;  %1914 = vmatprep.mubr.msk.bf16.mxu1 %vm344_vm1, %v338_v28  ;;  %v2123_v30 = vunpack.i.h.bf16 %v2119_v29  ;;  %v2120_v31 = vunpack.i.l.bf16 %v2119_v29 }
  0xe5   : > { %v2124_v32 = vpop.trf.xlu0 }
  0xe6   : > { %v2128_v33 = vunpack.i.h.bf16 %v2124_v32  ;;  %v2125_v34 = vunpack.i.l.bf16 %v2124_v32 }
  0xe8   : > { %v331_v35 = vpack.c.bf16 %v2125_v34, %v2120_v31  ;;  %v339_v36 = vpack.c.bf16 %v2128_v33, %v2123_v30 }
  0xe9   : > { %v2129_v37 = vpop.trf.xlu0 }
  0xea   : > { %348 = vst.msk [vmem:[#allocation2 + $0x18] sm:$0xff] %vm344_vm1, %v331_v35  ;;  %1899 = vmatmul.mubr.msk.bf16.gmra.mrb[4].mxu0 %vm344_vm1, %v331_v35  ;;  %356 = vst.msk [vmem:[#allocation2 + $0x58] sm:$0xff] %vm344_vm1, %v339_v36  ;;  %1915 = vmatmul.mubr.msk.bf16.gmra.mrb[4].mxu1 %vm344_vm1, %v339_v36  ;;  %v2133_v38 = vunpack.i.h.bf16 %v2129_v37  ;;  %v2130_v39 = vunpack.i.l.bf16 %v2129_v37 }
  0xed   : > { %v2134_v40 = vpop.trf.xlu0 }
  0xee   : > { %v2138_v41 = vunpack.i.h.bf16 %v2134_v40  ;;  %v2135_v42 = vunpack.i.l.bf16 %v2134_v40 }
  0xf0   : > { %v332_v43 = vpack.c.bf16 %v2135_v42, %v2130_v39  ;;  %v340_v44 = vpack.c.bf16 %v2138_v41, %v2133_v38 }
  0xf1   : > { %v2139_v45 = vpop.trf.xlu0 }
  0xf2   : > { %349 = vst.msk [vmem:[#allocation2 + $0x20] sm:$0xff] %vm344_vm1, %v332_v43  ;;  %1902 = vmatprep.mubr.msk.bf16.mxu0 %vm344_vm1, %v332_v43  ;;  %357 = vst.msk [vmem:[#allocation2 + $0x60] sm:$0xff] %vm344_vm1, %v340_v44  ;;  %1918 = vmatprep.mubr.msk.bf16.mxu1 %vm344_vm1, %v340_v44  ;;  %v2143_v46 = vunpack.i.h.bf16 %v2139_v45  ;;  %v2140_v47 = vunpack.i.l.bf16 %v2139_v45 }
  0xf5   : > { %v2144_v48 = vpop.trf.xlu0 }
  0xf6   : > { %v2148_v49 = vunpack.i.h.bf16 %v2144_v48  ;;  %v2145_v50 = vunpack.i.l.bf16 %v2144_v48 }
  0xf8   : > { %v333_v51 = vpack.c.bf16 %v2145_v50, %v2140_v47  ;;  %v341_v52 = vpack.c.bf16 %v2148_v49, %v2143_v46 }
  0xf9   : > { %v2149_v53 = vpop.trf.xlu0 }
  0xfa   : > { %350 = vst.msk [vmem:[#allocation2 + $0x28] sm:$0xff] %vm344_vm1, %v333_v51  ;;  %1903 = vmatmul.mubr.msk.bf16.gmra.mrb[8].mxu0 %vm344_vm1, %v333_v51  ;;  %358 = vst.msk [vmem:[#allocation2 + $0x68] sm:$0xff] %vm344_vm1, %v341_v52  ;;  %1919 = vmatmul.mubr.msk.bf16.gmra.mrb[8].mxu1 %vm344_vm1, %v341_v52  ;;  %v2153_v54 = vunpack.i.h.bf16 %v2149_v53  ;;  %v2150_v55 = vunpack.i.l.bf16 %v2149_v53 }
  0xfd   : > { %v2154_v56 = vpop.trf.xlu0 }
  0xfe   : > { %v2158_v57 = vunpack.i.h.bf16 %v2154_v56  ;;  %v2155_v58 = vunpack.i.l.bf16 %v2154_v56 }
 0x100   : > { %v334_v59 = vpack.c.bf16 %v2155_v58, %v2150_v55  ;;  %v342_v60 = vpack.c.bf16 %v2158_v57, %v2153_v54 }
 0x101   : > { %v2159_v61 = vpop.trf.xlu0 }
 0x102   : > { %351 = vst.msk [vmem:[#allocation2 + $0x30] sm:$0xff] %vm344_vm1, %v334_v59  ;;  %1906 = vmatprep.mubr.msk.bf16.mxu0 %vm344_vm1, %v334_v59  ;;  %359 = vst.msk [vmem:[#allocation2 + $0x70] sm:$0xff] %vm344_vm1, %v342_v60  ;;  %1922 = vmatprep.mubr.msk.bf16.mxu1 %vm344_vm1, %v342_v60  ;;  %v2163_v62 = vunpack.i.h.bf16 %v2159_v61  ;;  %v2160_v63 = vunpack.i.l.bf16 %v2159_v61 }
 0x105   : > { %v2164_v0 = vpop.trf.xlu0 }
 0x106   : > { %v2168_v1 = vunpack.i.h.bf16 %v2164_v0  ;;  %v2165_v2 = vunpack.i.l.bf16 %v2164_v0 }
 0x108   : > { %v335_v3 = vpack.c.bf16 %v2165_v2, %v2160_v63  ;;  %v343_v4 = vpack.c.bf16 %v2168_v1, %v2163_v62 }
 0x10a   : > { %352 = vst.msk [vmem:[#allocation2 + $0x38] sm:$0xff] %vm344_vm1, %v335_v3  ;;  %360 = vst.msk [vmem:[#allocation2 + $0x78] sm:$0xff] %vm344_vm1, %v343_v4  ;;  %1907 = vmatmul.mubr.msk.bf16.gmra.mrb[12].mxu0 %vm344_vm1, %v335_v3  ;;  %1923 = vmatmul.mubr.msk.bf16.gmra.mrb[12].mxu1 %vm344_vm1, %v343_v4 }
 0x1ad   : > { %v1896_v5 = vpop.f32.mrb[0].mxu0  ;;  %v1912_v6 = vpop.f32.mrb[0].mxu1 }
 0x1ae   : > { %v448_v7 = vpop.f32.mrb[1].mxu0  ;;  %v512_v8 = vpop.f32.mrb[1].mxu1 }
 0x1af   : > { %v1897_v9 = vpop.f32.mrb[2].mxu0  ;;  %v1913_v10 = vpop.f32.mrb[2].mxu1 }
 0x1b0   : > { %v576_v11 = vpack.c.bf16 %v1897_v9, %v1896_v5  ;;  %v584_v12 = vpack.c.bf16 %v1913_v10, %v1912_v6  ;;  %v451_v13 = vpop.f32.mrb[3].mxu0  ;;  %v515_v14 = vpop.f32.mrb[3].mxu1 }
 0x1b1   : > { %v575_v15 = vpack.c.bf16 %v451_v13, %v448_v7  ;;  %v583_v16 = vpack.c.bf16 %v515_v14, %v512_v8 }
 0x1b2   : > { %593 = vst.msk [vmem:[#allocation3 + $0x8] sm:$0xff] %vm591_vm2, %v576_v11  ;;  %601 = vst.msk [vmem:[#allocation3 + $0x48] sm:$0xff] %vm591_vm2, %v584_v12 }
 0x1b3   : > { %592 = vst.msk [vmem:[#allocation3] sm:$0xff] %vm591_vm2, %v575_v15  ;;  %600 = vst.msk [vmem:[#allocation3 + $0x40] sm:$0xff] %vm591_vm2, %v583_v16 }
 0x1bd   : > { %v1900_v17 = vpop.f32.mrb[4].mxu0  ;;  %v1916_v18 = vpop.f32.mrb[4].mxu1 }
 0x1be   : > { %v464_v19 = vpop.f32.mrb[5].mxu0  ;;  %v528_v20 = vpop.f32.mrb[5].mxu1 }
 0x1bf   : > { %v1901_v21 = vpop.f32.mrb[6].mxu0  ;;  %v1917_v22 = vpop.f32.mrb[6].mxu1 }
 0x1c0   : > { %v578_v23 = vpack.c.bf16 %v1901_v21, %v1900_v17  ;;  %v586_v24 = vpack.c.bf16 %v1917_v22, %v1916_v18  ;;  %v467_v25 = vpop.f32.mrb[7].mxu0  ;;  %v531_v26 = vpop.f32.mrb[7].mxu1 }
 0x1c1   : > { %v577_v27 = vpack.c.bf16 %v467_v25, %v464_v19  ;;  %v585_v28 = vpack.c.bf16 %v531_v26, %v528_v20 }
 0x1c2   : > { %595 = vst.msk [vmem:[#allocation3 + $0x18] sm:$0xff] %vm591_vm2, %v578_v23  ;;  %603 = vst.msk [vmem:[#allocation3 + $0x58] sm:$0xff] %vm591_vm2, %v586_v24 }
 0x1c3   : > { %594 = vst.msk [vmem:[#allocation3 + $0x10] sm:$0xff] %vm591_vm2, %v577_v27  ;;  %602 = vst.msk [vmem:[#allocation3 + $0x50] sm:$0xff] %vm591_vm2, %v585_v28 }
 0x1cd   : > { %v1904_v29 = vpop.f32.mrb[8].mxu0  ;;  %v1920_v30 = vpop.f32.mrb[8].mxu1 }
 0x1ce   : > { %v480_v31 = vpop.f32.mrb[9].mxu0  ;;  %v544_v32 = vpop.f32.mrb[9].mxu1 }
 0x1cf   : > { %v1905_v33 = vpop.f32.mrb[10].mxu0  ;;  %v1921_v34 = vpop.f32.mrb[10].mxu1 }
 0x1d0   : > { %v580_v35 = vpack.c.bf16 %v1905_v33, %v1904_v29  ;;  %v588_v36 = vpack.c.bf16 %v1921_v34, %v1920_v30  ;;  %v483_v37 = vpop.f32.mrb[11].mxu0  ;;  %v547_v38 = vpop.f32.mrb[11].mxu1 }
 0x1d1   : > { %v579_v39 = vpack.c.bf16 %v483_v37, %v480_v31  ;;  %v587_v40 = vpack.c.bf16 %v547_v38, %v544_v32 }
 0x1d2   : > { %597 = vst.msk [vmem:[#allocation3 + $0x28] sm:$0xff] %vm591_vm2, %v580_v35  ;;  %605 = vst.msk [vmem:[#allocation3 + $0x68] sm:$0xff] %vm591_vm2, %v588_v36 }
 0x1d3   : > { %596 = vst.msk [vmem:[#allocation3 + $0x20] sm:$0xff] %vm591_vm2, %v579_v39  ;;  %604 = vst.msk [vmem:[#allocation3 + $0x60] sm:$0xff] %vm591_vm2, %v587_v40 }
 0x1dd   : > { %v1908_v41 = vpop.f32.mrb[12].mxu0  ;;  %v1924_v42 = vpop.f32.mrb[12].mxu1 }
 0x1de   : > { %v496_v43 = vpop.f32.mrb[13].mxu0  ;;  %v560_v44 = vpop.f32.mrb[13].mxu1 }
 0x1df   : > { %v1909_v45 = vpop.f32.mrb[14].mxu0  ;;  %v1925_v46 = vpop.f32.mrb[14].mxu1 }
 0x1e0   : > { %v582_v47 = vpack.c.bf16 %v1909_v45, %v1908_v41  ;;  %v590_v48 = vpack.c.bf16 %v1925_v46, %v1924_v42  ;;  %v499_v49 = vpop.f32.mrb[15].mxu0  ;;  %v563_v50 = vpop.f32.mrb[15].mxu1 }
 0x1e1   : > { %v581_v51 = vpack.c.bf16 %v499_v49, %v496_v43  ;;  %v589_v52 = vpack.c.bf16 %v563_v50, %v560_v44 }
 0x1e2   : > { %599 = vst.msk [vmem:[#allocation3 + $0x38] sm:$0xff] %vm591_vm2, %v582_v47  ;;  %607 = vst.msk [vmem:[#allocation3 + $0x78] sm:$0xff] %vm591_vm2, %v590_v48 }
 0x1e3   : > { %598 = vst.msk [vmem:[#allocation3 + $0x30] sm:$0xff] %vm591_vm2, %v581_v51  ;;  %606 = vst.msk [vmem:[#allocation3 + $0x70] sm:$0xff] %vm591_vm2, %v589_v52 }
 0x1e4 PF: > { %s1711_s10 = sshll.u32 %s2403_s24, 7  ;;  %v654_v54 = vld [vmem:[%s2940_s1] sm:$0x3]  ;;  %vm680_vm3 = vcmask 1041408   ;;  %vm805_vm4 = vcmask 15360   ;;  %v798_v58 = vld [vmem:[#allocation3 + $0x48] sm:$0xff] }
 0x1e5   : > { %s609_s14 = sshra.s32 %s1711_s10, 7  ;;  %1974 = vmatprep.subr.msk.bf16.mxu0 %vm680_vm3, %v654_v54  ;;  %v682_v55 = vsel %vm680_vm3, %v654_v54, 0  ;;  %v797_v56 = vld [vmem:[#allocation3 + $0x40] sm:$0xff]  ;;  %v790_v60 = vld [vmem:[#allocation3 + $0x8] sm:$0xff]  ;;  %v799_v62 = vld [vmem:[#allocation3 + $0x50] sm:$0xff]  ;;  %vm655_vm5 = vcmask 31744  }
 0x1e6   : > { %s1712_s27 = sshll.u32 %s609_s14, 2  ;;  %1927 = vmatpush3.bf16.msra.mxu0 %v682_v55  ;;  %v789_v57 = vld [vmem:[#allocation3] sm:$0xff]  ;;  %1975 = vmatprep.subr.msk.bf16.mxu1 %vm805_vm4, %v797_v56  ;;  %v834_v61 = vsel %vm805_vm4, %v790_v60, 0  ;;  %v791_v63 = vld [vmem:[#allocation3 + $0x10] sm:$0xff]  ;;  %v800_v1 = vld [vmem:[#allocation3 + $0x58] sm:$0xff]  ;;  %vm1400_vm6 = vcmask 1043456  }
 0x1e7   : > { %s2669_s13 = scalar_lea.vmem %s228_s29, %s1712_s27 [#allocation4]  ;;  %v831_v59 = vsel %vm805_vm4, %v789_v57, 0  ;;  %v837_v0 = vsel %vm805_vm4, %v791_v63, 0  ;;  %v792_v2 = vld [vmem:[#allocation3 + $0x18] sm:$0xff]  ;;  %v801_v4 = vld [vmem:[#allocation3 + $0x60] sm:$0xff]  ;;  %v802_v7 = vld [vmem:[#allocation3 + $0x68] sm:$0xff]  ;;  %s1748_s14 = sshll.u32 %s2407_s25, 1 }
 0x1e8   : > { %v613_v53 = vld [vmem:[%s2669_s13] sm:$0xf]  ;;  %1780 = vmatpush3.bf16.xpose.msra.mxu1 %v831_v59  ;;  %v840_v3 = vsel %vm805_vm4, %v792_v2, 0  ;;  %v794_v8 = vld [vmem:[#allocation3 + $0x28] sm:$0xff]  ;;  %s1595_s27 = sadd.s32 %s2403_s24, %s1748_s14  ;;  %s1599_s7 = sshll.u32 %s254_s30, 4  ;;  %s2875_s7 = int_to_ptr.vmem [resolvable:$true] %s1599_s7 }
 0x1e9   : > { %614 = vxpose.xlu0.b32.start.end [1/1] (short) %v613_v53, 128  ;;  %1976 = vmatprep.subr.msk.bf16.mxu1 %vm805_vm4, %v798_v58  ;;  %v793_v5 = vld [vmem:[#allocation3 + $0x20] sm:$0xff]  ;;  %v846_v9 = vsel %vm805_vm4, %v794_v8, 0  ;;  %v804_v13 = vld [vmem:[#allocation3 + $0x78] sm:$0xff]  ;;  %v1208_v2 = vld [vmem:[#allocation2 + $0x48] sm:$0xff]  ;;  %s1749_s8 = sshll.u32 %s1595_s27, 6  ;;  %s1584_s24 = scalar_lea.sflag [#allocation6], %s252_s6 }
 0x1ea   : > { %v843_v6 = vsel %vm805_vm4, %v793_v5, 0  ;;  %v803_v10 = vld [vmem:[#allocation3 + $0x70] sm:$0xff]  ;;  %v796_v38 = vld [vmem:[#allocation3 + $0x38] sm:$0xff]  ;;  %s2873_s12 = scalar_lea.hbm %s2944_s5, %s1749_s8  ;;  %s2297_s25 = scalar_lea.vmem %s2875_s7, 64 }
 0x1eb   : > { %v795_v11 = vld [vmem:[#allocation3 + $0x30] sm:$0xff]  ;;  %v852_v39 = vsel %vm805_vm4, %v796_v38, 0  ;;  %p2298_p7 = scmp.ne.s32.totalorder %s2875_s7, %s2297_s25  ;;  %p2959_p2 = scmp.ne.s32.totalorder %s2954_s15, 0 }
 0x1ec   : > { %v849_v12 = vsel %vm805_vm4, %v795_v11, 0  ;;  %v1201_v5 = vld [vmem:[#allocation2 + $0x10] sm:$0xff] }
 0x1ed   : > { %p2299_p4 = pnand %p2298_p7, %p2959_p2 }
 0x1ef   : > { %p2300_p11 = pneg %p2299_p4 }
 0x1f0   : > { %1782 = vmatpush3.bf16.xpose.msra.mxu1 %v834_v61 }
 0x1f1   : > { %1977 = vmatprep.subr.msk.bf16.mxu1 %vm805_vm4, %v799_v62 }
 0x1f8   : > { %1784 = vmatpush3.bf16.xpose.msra.mxu1 %v837_v0  ;;  %v1207_v0 = vld [vmem:[#allocation2 + $0x40] sm:$0xff] }
 0x1f9   : > { %1978 = vmatprep.subr.msk.bf16.mxu1 %vm805_vm4, %v800_v1  ;;  %v1199_v1 = vld [vmem:[#allocation2] sm:$0xff]  ;;  %1811 = vmatprep.subr.bf16.mxu0 %v1207_v0 }
 0x200   : > { %1786 = vmatpush3.bf16.xpose.msra.mxu1 %v840_v3  ;;  %v1200_v3 = vld [vmem:[#allocation2 + $0x8] sm:$0xff] }
 0x201   : > { %1979 = vmatprep.subr.msk.bf16.mxu1 %vm805_vm4, %v801_v4  ;;  %v1209_v4 = vld [vmem:[#allocation2 + $0x50] sm:$0xff] }
 0x208   : > { %1788 = vmatpush3.bf16.xpose.msra.mxu1 %v843_v6 }
 0x209   : > { %1980 = vmatprep.subr.msk.bf16.mxu1 %vm805_vm4, %v802_v7 }
 0x210   : > { %1790 = vmatpush3.bf16.xpose.msra.mxu1 %v846_v9 }
 0x211   : > { %1981 = vmatprep.subr.msk.bf16.mxu1 %vm805_vm4, %v803_v10 }
 0x218   : > { %1792 = vmatpush3.bf16.xpose.msra.mxu1 %v849_v12 }
 0x219   : > { %1982 = vmatprep.subr.msk.bf16.mxu1 %vm805_vm4, %v804_v13 }
 0x220   : > { %1794 = vmatpush3.bf16.xpose.msra.mxu1 %v852_v39 }
 0x269   : > { %v630_v14 = vpop.trf.xlu0 }
 0x26d   : > { %v631_v15 = vpop.trf.xlu0 }
 0x26e   : > { %v646_v16 = vpack.c.bf16 %v631_v15, %v630_v14 }
 0x270   : > { %1928 = vmatprep.mubr.msk.bf16.mxu0 %vm655_vm5, %v646_v16 }
 0x271   : > { %v632_v17 = vpop.trf.xlu0 }
 0x275   : > { %v633_v18 = vpop.trf.xlu0 }
 0x276   : > { %v647_v19 = vpack.c.bf16 %v633_v18, %v632_v17 }
 0x278   : > { %1929 = vmatmul.mubr.msk.bf16.vlgmr.msra.gmra.mrb[0].mxu0 %vm655_vm5, %v647_v19 }
 0x279   : > { %v634_v20 = vpop.trf.xlu0  ;;  %1812 = vmatpush3.bf16.msra.mxu0 %v1199_v1 }
 0x27a   : > { %1813 = vmatprep.subr.bf16.mxu0 %v1208_v2 }
 0x27d   : > { %v635_v21 = vpop.trf.xlu0  ;;  %1814 = vmatpush3.bf16.msra.mxu0 %v1200_v3 }
 0x27e   : > { %v648_v22 = vpack.c.bf16 %v635_v21, %v634_v20  ;;  %1815 = vmatprep.subr.bf16.mxu0 %v1209_v4 }
 0x280   : > { %1932 = vmatprep.mubr.msk.bf16.mxu0 %vm655_vm5, %v648_v22  ;;  %v1210_v22 = vld [vmem:[#allocation2 + $0x58] sm:$0xff] }
 0x281   : > { %v636_v23 = vpop.trf.xlu0  ;;  %1816 = vmatpush3.bf16.msra.mxu0 %v1201_v5 }
 0x282   : > { %1817 = vmatprep.subr.bf16.mxu0 %v1210_v22 }
 0x285   : > { %v637_v24 = vpop.trf.xlu0 }
 0x286   : > { %v649_v25 = vpack.c.bf16 %v637_v24, %v636_v23  ;;  %v1202_v24 = vld [vmem:[#allocation2 + $0x18] sm:$0xff] }
 0x287   : > { %1818 = vmatpush3.bf16.msra.mxu0 %v1202_v24 }
 0x288   : > { %1933 = vmatmul.mubr.msk.bf16.gmra.mrb[4].mxu0 %vm655_vm5, %v649_v25 }
 0x289   : > { %v638_v26 = vpop.trf.xlu0 }
 0x28d   : > { %v639_v27 = vpop.trf.xlu0 }
 0x28e   : > { %v650_v28 = vpack.c.bf16 %v639_v27, %v638_v26  ;;  %v1211_v26 = vld [vmem:[#allocation2 + $0x60] sm:$0xff] }
 0x28f   : > { %1819 = vmatprep.subr.bf16.mxu0 %v1211_v26  ;;  %v1203_v27 = vld [vmem:[#allocation2 + $0x20] sm:$0xff] }
 0x290   : > { %1936 = vmatprep.mubr.msk.bf16.mxu0 %vm655_vm5, %v650_v28  ;;  %1820 = vmatpush3.bf16.msra.mxu0 %v1203_v27 }
 0x291   : > { %v640_v29 = vpop.trf.xlu0 }
 0x295   : > { %v641_v30 = vpop.trf.xlu0 }
 0x296   : > { %v651_v31 = vpack.c.bf16 %v641_v30, %v640_v29 }
 0x298   : > { %1937 = vmatmul.mubr.msk.bf16.gmra.mrb[8].mxu0 %vm655_vm5, %v651_v31 }
 0x299   : > { %v642_v32 = vpop.trf.xlu0 }
 0x29d   : > { %v643_v33 = vpop.trf.xlu0 }
 0x29e   : > { %v652_v34 = vpack.c.bf16 %v643_v33, %v642_v32  ;;  %v1212_v32 = vld [vmem:[#allocation2 + $0x68] sm:$0xff] }
 0x29f   : > { %1821 = vmatprep.subr.bf16.mxu0 %v1212_v32 }
 0x2a0   : > { %1940 = vmatprep.mubr.msk.bf16.mxu0 %vm655_vm5, %v652_v34  ;;  %v1204_v34 = vld [vmem:[#allocation2 + $0x28] sm:$0xff] }
 0x2a1   : > { %v644_v35 = vpop.trf.xlu0  ;;  %1822 = vmatpush3.bf16.msra.mxu0 %v1204_v34 }
 0x2a5   : > { %v645_v36 = vpop.trf.xlu0 }
 0x2a6   : > { %v653_v37 = vpack.c.bf16 %v645_v36, %v644_v35  ;;  %v1213_v36 = vld [vmem:[#allocation2 + $0x70] sm:$0xff] }
 0x2a7   : > { %1823 = vmatprep.subr.bf16.mxu0 %v1213_v36 }
 0x2a8   : > { %1941 = vmatmul.mubr.msk.bf16.gmra.mrb[12].mxu0 %vm655_vm5, %v653_v37  ;;  %v1205_v37 = vld [vmem:[#allocation2 + $0x30] sm:$0xff] }
 0x2a9   : > { %1824 = vmatpush3.bf16.msra.mxu0 %v1205_v37 }
 0x34b   : > { %v1930_v40 = vpop.f32.mrb[0].mxu0 }
 0x34c   : > { %v718_v41 = vpop.f32.mrb[1].mxu0 }
 0x34d   : > { %v1931_v42 = vpop.f32.mrb[2].mxu0 }
 0x34e   : > { %v782_v43 = vpack.c.bf16 %v1931_v42, %v1930_v40  ;;  %v721_v44 = vpop.f32.mrb[3].mxu0  ;;  %v1214_v42 = vld [vmem:[#allocation2 + $0x78] sm:$0xff] }
 0x34f   : > { %v781_v45 = vpack.c.bf16 %v721_v44, %v718_v41  ;;  %1825 = vmatprep.subr.bf16.mxu0 %v1214_v42  ;;  %v1206_v44 = vld [vmem:[#allocation2 + $0x38] sm:$0xff] }
 0x350   : > { %1826 = vmatpush3.bf16.msra.mxu0 %v1206_v44 }
 0x351   : > { %1795 = vmatprep.mubr.msk.bf16.mxu1 %vm805_vm4, %v781_v45 }
 0x352   : > { %1796 = vmatmul.mubr.msk.bf16.vlgmr.msra.gmra.mrb[0].mxu1 %vm805_vm4, %v781_v45 }
 0x353   : > { %1797 = vmatprep.mubr.msk.bf16.mxu1 %vm805_vm4, %v782_v43 }
 0x35a   : > { %1798 = vmatmul.mubr.msk.bf16.gmra.mrb[4].mxu1 %vm805_vm4, %v782_v43 }
 0x35b   : > { %v1934_v46 = vpop.f32.mrb[4].mxu0 }
 0x35c   : > { %v734_v47 = vpop.f32.mrb[5].mxu0 }
 0x35d   : > { %v1935_v48 = vpop.f32.mrb[6].mxu0 }
 0x35e   : > { %v784_v49 = vpack.c.bf16 %v1935_v48, %v1934_v46  ;;  %v737_v50 = vpop.f32.mrb[7].mxu0 }
 0x35f   : > { %v783_v51 = vpack.c.bf16 %v737_v50, %v734_v47 }
 0x361   : > { %1799 = vmatprep.mubr.msk.bf16.mxu1 %vm805_vm4, %v783_v51 }
 0x362   : > { %1800 = vmatmul.mubr.msk.bf16.gmra.mrb[8].mxu1 %vm805_vm4, %v783_v51 }
 0x363   : > { %1801 = vmatprep.mubr.msk.bf16.mxu1 %vm805_vm4, %v784_v49 }
 0x36a   : > { %1802 = vmatmul.mubr.msk.bf16.gmra.mrb[12].mxu1 %vm805_vm4, %v784_v49 }
 0x36b   : > { %v1938_v52 = vpop.f32.mrb[8].mxu0 }
 0x36c   : > { %v750_v53 = vpop.f32.mrb[9].mxu0 }
 0x36d   : > { %v1939_v54 = vpop.f32.mrb[10].mxu0 }
 0x36e   : > { %v786_v55 = vpack.c.bf16 %v1939_v54, %v1938_v52  ;;  %v753_v56 = vpop.f32.mrb[11].mxu0 }
 0x36f   : > { %v785_v57 = vpack.c.bf16 %v753_v56, %v750_v53 }
 0x371   : > { %1803 = vmatprep.mubr.msk.bf16.mxu1 %vm805_vm4, %v785_v57 }
 0x372   : > { %1804 = vmatmul.mubr.msk.bf16.gmra.mrb[16].mxu1 %vm805_vm4, %v785_v57 }
 0x373   : > { %1805 = vmatprep.mubr.msk.bf16.mxu1 %vm805_vm4, %v786_v55 }
 0x37a   : > { %1806 = vmatmul.mubr.msk.bf16.gmra.mrb[20].mxu1 %vm805_vm4, %v786_v55 }
 0x37b   : > { %v1942_v58 = vpop.f32.mrb[12].mxu0 }
 0x37c   : > { %v766_v59 = vpop.f32.mrb[13].mxu0 }
 0x37d   : > { %v1943_v60 = vpop.f32.mrb[14].mxu0 }
 0x37e   : > { %v788_v61 = vpack.c.bf16 %v1943_v60, %v1942_v58  ;;  %v769_v62 = vpop.f32.mrb[15].mxu0 }
 0x37f   : > { %v787_v63 = vpack.c.bf16 %v769_v62, %v766_v59 }
 0x381   : > { %1807 = vmatprep.mubr.msk.bf16.mxu1 %vm805_vm4, %v787_v63 }
 0x382   : > { %1808 = vmatmul.mubr.msk.bf16.gmra.mrb[24].mxu1 %vm805_vm4, %v787_v63 }
 0x383   : > { %1809 = vmatprep.mubr.msk.bf16.mxu1 %vm805_vm4, %v788_v61 }
 0x38a   : > { %1810 = vmatmul.mubr.msk.bf16.gmra.mrb[28].mxu1 %vm805_vm4, %v788_v61 }
 0x425   : > { %v2715_v6 = vpop.f32.mrb[0].mxu1 }
 0x426   : > { %v2717_v7 = vpop.f32.mrb[1].mxu1 }
 0x427   : > { %v2719_v8 = vpop.f32.mrb[2].mxu1  ;;  %v991_v9 = vmax.f32 %v2715_v6, %v2717_v7 }
 0x428   : > { %v2723_v10 = vpop.f32.mrb[3].mxu1 }
 0x429   : > { %992 = vmax.xlane.f32.xlu0 %v991_v9  ;;  %v994_v11 = vmax.f32 %v2719_v8, %v2723_v10 }
 0x42b   : > { %995 = vmax.xlane.f32.xlu1 %v994_v11 }
 0x42d   : > { %v2727_v12 = vpop.f32.mrb[4].mxu1 }
 0x42e   : > { %v2729_v13 = vpop.f32.mrb[5].mxu1 }
 0x42f   : > { %v2731_v14 = vpop.f32.mrb[6].mxu1  ;;  %v997_v15 = vmax.f32 %v2727_v12, %v2729_v13 }
 0x430   : > { %v2735_v16 = vpop.f32.mrb[7].mxu1 }
 0x431   : > { %998 = vmax.xlane.f32.xlu1 %v997_v15  ;;  %v1000_v17 = vmax.f32 %v2731_v14, %v2735_v16 }
 0x435   : > { %1001 = vmax.xlane.f32.xlu1 %v1000_v17  ;;  %v2739_v18 = vpop.f32.mrb[8].mxu1 }
 0x436   : > { %v2741_v19 = vpop.f32.mrb[9].mxu1 }
 0x437   : > { %v2743_v20 = vpop.f32.mrb[10].mxu1  ;;  %v1003_v21 = vmax.f32 %v2739_v18, %v2741_v19 }
 0x438   : > { %v2747_v23 = vpop.f32.mrb[11].mxu1 }
 0x439   : > { %1004 = vmax.xlane.f32.xlu1 %v1003_v21  ;;  %v1006_v25 = vmax.f32 %v2743_v20, %v2747_v23 }
 0x43d   : > { %1007 = vmax.xlane.f32.xlu1 %v1006_v25  ;;  %v2751_v28 = vpop.f32.mrb[12].mxu1 }
 0x43e   : > { %v2753_v29 = vpop.f32.mrb[13].mxu1 }
 0x43f   : > { %v2755_v30 = vpop.f32.mrb[14].mxu1  ;;  %v1009_v31 = vmax.f32 %v2751_v28, %v2753_v29 }
 0x440   : > { %v2759_v33 = vpop.f32.mrb[15].mxu1 }
 0x441   : > { %1010 = vmax.xlane.f32.xlu1 %v1009_v31  ;;  %v1012_v35 = vmax.f32 %v2755_v30, %v2759_v33 }
 0x445   : > { %1013 = vmax.xlane.f32.xlu1 %v1012_v35  ;;  %v2763_v38 = vpop.f32.mrb[16].mxu1 }
 0x446   : > { %v2765_v39 = vpop.f32.mrb[17].mxu1 }
 0x447   : > { %v2767_v40 = vpop.f32.mrb[18].mxu1  ;;  %v1015_v41 = vmax.f32 %v2763_v38, %v2765_v39 }
 0x448   : > { %v2771_v43 = vpop.f32.mrb[19].mxu1 }
 0x449   : > { %1016 = vmax.xlane.f32.xlu1 %v1015_v41  ;;  %v1018_v45 = vmax.f32 %v2767_v40, %v2771_v43 }
 0x44d   : > { %1019 = vmax.xlane.f32.xlu1 %v1018_v45  ;;  %v2775_v46 = vpop.f32.mrb[20].mxu1 }
 0x44e   : > { %v2777_v47 = vpop.f32.mrb[21].mxu1 }
 0x44f   : > { %v2779_v48 = vpop.f32.mrb[22].mxu1  ;;  %v1021_v49 = vmax.f32 %v2775_v46, %v2777_v47 }
 0x450   : > { %v2783_v50 = vpop.f32.mrb[23].mxu1 }
 0x451   : > { %1022 = vmax.xlane.f32.xlu1 %v1021_v49  ;;  %v1024_v51 = vmax.f32 %v2779_v48, %v2783_v50 }
 0x455   : > { %1025 = vmax.xlane.f32.xlu1 %v1024_v51  ;;  %v2787_v52 = vpop.f32.mrb[24].mxu1 }
 0x456   : > { %v2789_v53 = vpop.f32.mrb[25].mxu1 }
 0x457   : > { %v2791_v54 = vpop.f32.mrb[26].mxu1  ;;  %v1027_v55 = vmax.f32 %v2787_v52, %v2789_v53 }
 0x458   : > { %v2795_v56 = vpop.f32.mrb[27].mxu1 }
 0x459   : > { %1028 = vmax.xlane.f32.xlu1 %v1027_v55  ;;  %v1030_v57 = vmax.f32 %v2791_v54, %v2795_v56 }
 0x45d   : > { %1031 = vmax.xlane.f32.xlu1 %v1030_v57  ;;  %v2799_v58 = vpop.f32.mrb[28].mxu1 }
 0x45e   : > { %v2801_v59 = vpop.f32.mrb[29].mxu1 }
 0x45f   : > { %v2803_v60 = vpop.f32.mrb[30].mxu1  ;;  %v1033_v61 = vmax.f32 %v2799_v58, %v2801_v59 }
 0x460   : > { %v2807_v62 = vpop.f32.mrb[31].mxu1 }
 0x461   : > { %v1036_v63 = vmax.f32 %v2803_v60, %v2807_v62  ;;  %1034 = vmax.xlane.f32.xlu1 %v1033_v61 }
 0x465   : > { %1037 = vmax.xlane.f32.xlu1 %v1036_v63 }
 0x4b6   : > { %v993_v0 = vpop.xlane.xlu0 %992 }
 0x4b7   : > { %v1039_v1 = vsub.f32 %v2715_v6, %v993_v0  ;;  %v1040_v2 = vsub.f32 %v2717_v7, %v993_v0 }
 0x4b8   : > { %v996_v3 = vpop.xlane.xlu1 %995 }
 0x4b9   : > { %v1071_v4 = vmul.f32 1.442695, %v1039_v1  ;;  %v1073_v5 = vmul.f32 1.442695, %v1040_v2  ;;  %v1041_v9 = vsub.f32 %v2719_v8, %v996_v3  ;;  %v1042_v11 = vsub.f32 %v2723_v10, %v996_v3 }
 0x4bb   : > { %2170 = vpow2.f32 %v1071_v4  ;;  %v1075_v15 = vmul.f32 1.442695, %v1041_v9  ;;  %v1077_v17 = vmul.f32 1.442695, %v1042_v11 }
 0x4bc   : > { %2172 = vpow2.f32 %v1073_v5 }
 0x4bd   : > { %2174 = vpow2.f32 %v1075_v15 }
 0x4be   : > { %2176 = vpow2.f32 %v1077_v17  ;;  %v999_v21 = vpop.xlane.xlu1 %998 }
 0x4bf   : > { %v1043_v22 = vsub.f32 %v2727_v12, %v999_v21  ;;  %v1044_v6 = vsub.f32 %v2729_v13, %v999_v21 }
 0x4c1   : > { %v1079_v24 = vmul.f32 1.442695, %v1043_v22  ;;  %v1081_v7 = vmul.f32 1.442695, %v1044_v6 }
 0x4c2   : > { %v1002_v25 = vpop.xlane.xlu1 %1001 }
 0x4c3   : > { %2178 = vpow2.f32 %v1079_v24  ;;  %v1045_v26 = vsub.f32 %v2731_v14, %v1002_v25  ;;  %v1046_v8 = vsub.f32 %v2735_v16, %v1002_v25 }
 0x4c4   : > { %2180 = vpow2.f32 %v1081_v7 }
 0x4c5   : > { %v2171_v10 = vpop.eup %2170  ;;  %v1083_v27 = vmul.f32 1.442695, %v1045_v26  ;;  %v1085_v31 = vmul.f32 1.442695, %v1046_v8 }
 0x4c6   : > { %v2173_v32 = vpop.eup %2172  ;;  %v1005_v34 = vpop.xlane.xlu1 %1004 }
 0x4c7   : > { %v2175_v35 = vpop.eup %2174  ;;  %2182 = vpow2.f32 %v1083_v27  ;;  %v1047_v12 = vsub.f32 %v2739_v18, %v1005_v34  ;;  %v1048_v13 = vsub.f32 %v2741_v19, %v1005_v34  ;;  %v1135_v36 = vadd.f32 %v2173_v32, %v2171_v10 }
 0x4c8   : > { %v2177_v37 = vpop.eup %2176  ;;  %2184 = vpow2.f32 %v1085_v31  ;;  %v1183_v41 = vpack.c.bf16 %v2175_v35, %v2171_v10 }
 0x4c9   : > { %v1087_v42 = vmul.f32 1.442695, %v1047_v12  ;;  %v1089_v14 = vmul.f32 1.442695, %v1048_v13  ;;  %1136 = vadd.xlane.f32.xlu1 %v1135_v36  ;;  %v1184_v16 = vpack.c.bf16 %v2177_v37, %v2173_v32  ;;  %v1138_v44 = vadd.f32 %v2177_v37, %v2175_v35 }
 0x4ca   : > { %v1008_v45 = vpop.xlane.xlu1 %1007 }
 0x4cb   : > { %2186 = vpow2.f32 %v1087_v42  ;;  %v1049_v49 = vsub.f32 %v2743_v20, %v1008_v45  ;;  %v1050_v51 = vsub.f32 %v2747_v23, %v1008_v45  ;;  %1247 = vmatprep.mubr.bf16.mxu0 %v1184_v16 }
 0x4cc   : > { %2188 = vpow2.f32 %v1089_v14  ;;  %1248 = vmatmul.mubr.bf16.vlgmr.msra.gmra.mrb[16].mxu0 %v1183_v41 }
 0x4cd   : > { %v2179_v18 = vpop.eup %2178  ;;  %v1091_v19 = vmul.f32 1.442695, %v1049_v49  ;;  %v1093_v55 = vmul.f32 1.442695, %v1050_v51  ;;  %1139 = vadd.xlane.f32.xlu1 %v1138_v44 }
 0x4ce   : > { %v2181_v57 = vpop.eup %2180  ;;  %v1011_v61 = vpop.xlane.xlu1 %1010 }
 0x4cf   : > { %2190 = vpow2.f32 %v1091_v19  ;;  %v1051_v63 = vsub.f32 %v2751_v28, %v1011_v61  ;;  %v1052_v0 = vsub.f32 %v2753_v29, %v1011_v61  ;;  %v1141_v1 = vadd.f32 %v2181_v57, %v2179_v18 }
 0x4d0   : > { %2192 = vpow2.f32 %v1093_v55 }
 0x4d1   : > { %v2183_v2 = vpop.eup %2182  ;;  %v1095_v20 = vmul.f32 1.442695, %v1051_v63  ;;  %v1097_v3 = vmul.f32 1.442695, %v1052_v0  ;;  %1142 = vadd.xlane.f32.xlu1 %v1141_v1 }
 0x4d2   : > { %v2185_v23 = vpop.eup %2184  ;;  %v1014_v4 = vpop.xlane.xlu1 %1013  ;;  %v1185_v5 = vpack.c.bf16 %v2183_v2, %v2179_v18 }
 0x4d3   : > { %2194 = vpow2.f32 %v1095_v20  ;;  %v1053_v9 = vsub.f32 %v2755_v30, %v1014_v4  ;;  %v1054_v11 = vsub.f32 %v2759_v33, %v1014_v4  ;;  %v1186_v15 = vpack.c.bf16 %v2185_v23, %v2181_v57 }
 0x4d4   : > { %2196 = vpow2.f32 %v1097_v3  ;;  %v1144_v17 = vadd.f32 %v2185_v23, %v2183_v2 }
 0x4d5   : > { %v2187_v28 = vpop.eup %2186  ;;  %v1099_v21 = vmul.f32 1.442695, %v1053_v9  ;;  %v1101_v29 = vmul.f32 1.442695, %v1054_v11  ;;  %1255 = vmatprep.mubr.bf16.mxu0 %v1186_v15 }
 0x4d6   : > { %v2189_v22 = vpop.eup %2188  ;;  %1145 = vadd.xlane.f32.xlu1 %v1144_v17  ;;  %1256 = vmatmul.mubr.bf16.gmra.mrb[20].mxu0 %v1185_v5  ;;  %v1017_v6 = vpop.xlane.xlu1 %1016 }
 0x4d7   : > { %2198 = vpow2.f32 %v1099_v21  ;;  %v1055_v24 = vsub.f32 %v2763_v38, %v1017_v6  ;;  %v1056_v7 = vsub.f32 %v2765_v39, %v1017_v6  ;;  %v1147_v25 = vadd.f32 %v2189_v22, %v2187_v28 }
 0x4d8   : > { %2200 = vpow2.f32 %v1101_v29 }
 0x4d9   : > { %v2191_v30 = vpop.eup %2190  ;;  %v1103_v33 = vmul.f32 1.442695, %v1055_v24  ;;  %v1105_v26 = vmul.f32 1.442695, %v1056_v7 }
 0x4da   : > { %v2193_v8 = vpop.eup %2192  ;;  %1148 = vadd.xlane.f32.xlu1 %v1147_v25  ;;  %v1020_v10 = vpop.xlane.xlu1 %1019  ;;  %v1187_v27 = vpack.c.bf16 %v2191_v30, %v2187_v28 }
 0x4db   : > { %2202 = vpow2.f32 %v1103_v33  ;;  %v1057_v31 = vsub.f32 %v2767_v40, %v1020_v10  ;;  %v1058_v32 = vsub.f32 %v2771_v43, %v1020_v10  ;;  %v1188_v34 = vpack.c.bf16 %v2193_v8, %v2189_v22 }
 0x4dc   : > { %2204 = vpow2.f32 %v1105_v26  ;;  %v1150_v35 = vadd.f32 %v2193_v8, %v2191_v30 }
 0x4dd   : > { %v2195_v38 = vpop.eup %2194  ;;  %v1107_v12 = vmul.f32 1.442695, %v1057_v31  ;;  %v1109_v39 = vmul.f32 1.442695, %v1058_v32  ;;  %1263 = vmatprep.mubr.bf16.mxu0 %v1188_v34 }
 0x4de   : > { %v2197_v13 = vpop.eup %2196  ;;  %1151 = vadd.xlane.f32.xlu1 %v1150_v35  ;;  %1264 = vmatmul.mubr.bf16.gmra.mrb[24].mxu0 %v1187_v27  ;;  %v1023_v36 = vpop.xlane.xlu1 %1022 }
 0x4df   : > { %2206 = vpow2.f32 %v1107_v12  ;;  %v1059_v37 = vsub.f32 %v2775_v46, %v1023_v36  ;;  %v1060_v41 = vsub.f32 %v2777_v47, %v1023_v36  ;;  %v1153_v42 = vadd.f32 %v2197_v13, %v2195_v38 }
 0x4e0   : > { %2208 = vpow2.f32 %v1109_v39 }
 0x4e1   : > { %v2199_v40 = vpop.eup %2198  ;;  %v1111_v43 = vmul.f32 1.442695, %v1059_v37  ;;  %v1113_v14 = vmul.f32 1.442695, %v1060_v41 }
 0x4e2   : > { %v2201_v16 = vpop.eup %2200  ;;  %1154 = vadd.xlane.f32.xlu1 %v1153_v42  ;;  %v1026_v44 = vpop.xlane.xlu1 %1025  ;;  %v1189_v45 = vpack.c.bf16 %v2199_v40, %v2195_v38 }
 0x4e3   : > { %2210 = vpow2.f32 %v1111_v43  ;;  %v1061_v49 = vsub.f32 %v2779_v48, %v1026_v44  ;;  %v1062_v51 = vsub.f32 %v2783_v50, %v1026_v44  ;;  %v1190_v18 = vpack.c.bf16 %v2201_v16, %v2197_v13  ;;  %v1344_v48 = vld [vmem:[%s2942_s3] sm:$0xf] }
 0x4e4   : > { %2212 = vpow2.f32 %v1113_v14  ;;  %v1156_v19 = vadd.f32 %v2201_v16, %v2199_v40  ;;  %1944 = vmatprep.subr.msk.mxu0 %vm1400_vm6, %v1344_v48 }
 0x4e5   : > { %v2203_v46 = vpop.eup %2202  ;;  %v1115_v55 = vmul.f32 1.442695, %v1061_v49  ;;  %v1117_v47 = vmul.f32 1.442695, %v1062_v51  ;;  %1271 = vmatprep.mubr.bf16.mxu0 %v1190_v18  ;;  %1945 = vmatpush3.msk.msra.mxu0 %vm1400_vm6, %v1344_v48 }
 0x4e6   : > { %v2205_v57 = vpop.eup %2204  ;;  %1157 = vadd.xlane.f32.xlu1 %v1156_v19  ;;  %1272 = vmatmul.mubr.bf16.gmra.mrb[28].mxu0 %v1189_v45  ;;  %v1029_v61 = vpop.xlane.xlu1 %1028 }
 0x4e7   : > { %2214 = vpow2.f32 %v1115_v55  ;;  %v1063_v63 = vsub.f32 %v2787_v52, %v1029_v61  ;;  %v1064_v0 = vsub.f32 %v2789_v53, %v1029_v61  ;;  %v1159_v1 = vadd.f32 %v2205_v57, %v2203_v46 }
 0x4e8   : > { %2216 = vpow2.f32 %v1117_v47 }
 0x4e9   : > { %v2207_v50 = vpop.eup %2206  ;;  %v1119_v2 = vmul.f32 1.442695, %v1063_v63  ;;  %v1121_v20 = vmul.f32 1.442695, %v1064_v0 }
 0x4ea   : > { %v2209_v3 = vpop.eup %2208  ;;  %1160 = vadd.xlane.f32.xlu1 %v1159_v1  ;;  %v1032_v23 = vpop.xlane.xlu1 %1031  ;;  %v1191_v4 = vpack.c.bf16 %v2207_v50, %v2203_v46 }
 0x4eb   : > { %2218 = vpow2.f32 %v1119_v2  ;;  %v1065_v52 = vsub.f32 %v2791_v54, %v1032_v23  ;;  %v1066_v53 = vsub.f32 %v2795_v56, %v1032_v23  ;;  %v1192_v5 = vpack.c.bf16 %v2209_v3, %v2205_v57 }
 0x4ec   : > { %2220 = vpow2.f32 %v1121_v20  ;;  %v1162_v9 = vadd.f32 %v2209_v3, %v2207_v50 }
 0x4ed   : > { %v2211_v11 = vpop.eup %2210  ;;  %v1123_v15 = vmul.f32 1.442695, %v1065_v52  ;;  %v1125_v17 = vmul.f32 1.442695, %v1066_v53  ;;  %1279 = vmatprep.mubr.bf16.mxu0 %v1192_v5 }
 0x4ee   : > { %v2213_v28 = vpop.eup %2212  ;;  %1163 = vadd.xlane.f32.xlu1 %v1162_v9  ;;  %1280 = vmatmul.mubr.bf16.gmra.mrb[32].mxu0 %v1191_v4  ;;  %v1035_v21 = vpop.xlane.xlu1 %1034 }
 0x4ef   : > { %2222 = vpow2.f32 %v1123_v15  ;;  %v1067_v29 = vsub.f32 %v2799_v58, %v1035_v21  ;;  %v1068_v22 = vsub.f32 %v2801_v59, %v1035_v21  ;;  %v1165_v6 = vadd.f32 %v2213_v28, %v2211_v11 }
 0x4f0   : > { %2224 = vpow2.f32 %v1125_v17 }
 0x4f1   : > { %v2215_v54 = vpop.eup %2214  ;;  %v1127_v56 = vmul.f32 1.442695, %v1067_v29  ;;  %v1129_v24 = vmul.f32 1.442695, %v1068_v22 }
 0x4f2   : > { %v2217_v7 = vpop.eup %2216  ;;  %1166 = vadd.xlane.f32.xlu1 %v1165_v6  ;;  %v1038_v25 = vpop.xlane.xlu1 %1037  ;;  %v1193_v30 = vpack.c.bf16 %v2215_v54, %v2211_v11 }
 0x4f3   : > { %2226 = vpow2.f32 %v1127_v56  ;;  %v1069_v33 = vsub.f32 %v2803_v60, %v1038_v25  ;;  %v1070_v26 = vsub.f32 %v2807_v62, %v1038_v25  ;;  %v1194_v8 = vpack.c.bf16 %v2217_v7, %v2213_v28 }
 0x4f4   : > { %2228 = vpow2.f32 %v1129_v24  ;;  %v1168_v10 = vadd.f32 %v2217_v7, %v2215_v54 }
 0x4f5   : > { %v2219_v58 = vpop.eup %2218  ;;  %v1131_v27 = vmul.f32 1.442695, %v1069_v33  ;;  %v1133_v59 = vmul.f32 1.442695, %v1070_v26  ;;  %1287 = vmatprep.mubr.bf16.mxu0 %v1194_v8 }
 0x4f6   : > { %v2221_v31 = vpop.eup %2220  ;;  %1169 = vadd.xlane.f32.xlu1 %v1168_v10  ;;  %1288 = vmatmul.mubr.bf16.gmra.mrb[36].mxu0 %v1193_v30 }
 0x4f7   : > { %2230 = vpow2.f32 %v1131_v27  ;;  %v1171_v32 = vadd.f32 %v2221_v31, %v2219_v58 }
 0x4f8   : > { %2232 = vpow2.f32 %v1133_v59 }
 0x4f9   : > { %v2223_v34 = vpop.eup %2222 }
 0x4fa   : > { %v2225_v35 = vpop.eup %2224  ;;  %1172 = vadd.xlane.f32.xlu1 %v1171_v32  ;;  %v1195_v38 = vpack.c.bf16 %v2223_v34, %v2219_v58 }
 0x4fb   : > { %v1174_v60 = vadd.f32 %v2225_v35, %v2223_v34  ;;  %v1196_v12 = vpack.c.bf16 %v2225_v35, %v2221_v31 }
 0x4fd   : > { %v2227_v62 = vpop.eup %2226  ;;  %1175 = vadd.xlane.f32.xlu0 %v1174_v60  ;;  %1295 = vmatprep.mubr.bf16.mxu0 %v1196_v12 }
 0x4fe   : > { %v2229_v39 = vpop.eup %2228  ;;  %1296 = vmatmul.mubr.bf16.gmra.mrb[40].mxu0 %v1195_v38 }
 0x4ff   : > { %v1177_v13 = vadd.f32 %v2229_v39, %v2227_v62 }
 0x501   : > { %v2231_v36 = vpop.eup %2230  ;;  %1178 = vadd.xlane.f32.xlu1 %v1177_v13 }
 0x502   : > { %v2233_v37 = vpop.eup %2232  ;;  %v1197_v41 = vpack.c.bf16 %v2231_v36, %v2227_v62 }
 0x503   : > { %v1180_v42 = vadd.f32 %v2233_v37, %v2231_v36  ;;  %v1198_v40 = vpack.c.bf16 %v2233_v37, %v2229_v39 }
 0x505   : > { %1181 = vadd.xlane.f32.xlu0 %v1180_v42  ;;  %1303 = vmatprep.mubr.bf16.mxu0 %v1198_v40 }
 0x506   : > { %1304 = vmatmul.mubr.bf16.gmra.mrb[44].mxu0 %v1197_v41 }
 0x556   : > { %v1137_v43 = vpop.xlane.xlu1 %1136 }
 0x557   : > { %2234 = vrcp.f32 %v1137_v43 }
 0x55a   : > { %v1140_v14 = vpop.xlane.xlu1 %1139 }
 0x55b   : > { %2236 = vrcp.f32 %v1140_v14 }
 0x55e   : > { %v1143_v16 = vpop.xlane.xlu1 %1142 }
 0x55f   : > { %2238 = vrcp.f32 %v1143_v16 }
 0x561   : > { %v2235_v55 = vpop.eup %2234 }
 0x563   : > { %v1146_v44 = vpop.xlane.xlu1 %1145 }
 0x564   : > { %2240 = vrcp.f32 %v1146_v44 }
 0x565   : > { %v2237_v0 = vpop.eup %2236 }
 0x567   : > { %v1149_v45 = vpop.xlane.xlu1 %1148 }
 0x568   : > { %2242 = vrcp.f32 %v1149_v45 }
 0x569   : > { %v2239_v23 = vpop.eup %2238 }
 0x56b   : > { %v1152_v49 = vpop.xlane.xlu1 %1151 }
 0x56c   : > { %2244 = vrcp.f32 %v1152_v49 }
 0x56e   : > { %v2241_v5 = vpop.eup %2240 }
 0x56f   : > { %v1155_v57 = vpop.xlane.xlu1 %1154 }
 0x570   : > { %2246 = vrcp.f32 %v1155_v57 }
 0x572   : > { %v2243_v29 = vpop.eup %2242 }
 0x573   : > { %v1158_v48 = vpop.xlane.xlu1 %1157 }
 0x574   : > { %2248 = vrcp.f32 %v1158_v48 }
 0x576   : > { %v2245_v24 = vpop.eup %2244 }
 0x577   : > { %v1161_v9 = vpop.xlane.xlu1 %1160 }
 0x578   : > { %2250 = vrcp.f32 %v1161_v9 }
 0x57a   : > { %v2247_v10 = vpop.eup %2246 }
 0x57b   : > { %v1164_v6 = vpop.xlane.xlu1 %1163 }
 0x57c   : > { %2252 = vrcp.f32 %v1164_v6 }
 0x57e   : > { %v2249_v31 = vpop.eup %2248 }
 0x57f   : > { %v1167_v33 = vpop.xlane.xlu1 %1166 }
 0x580   : > { %2254 = vrcp.f32 %v1167_v33 }
 0x582   : > { %v2251_v62 = vpop.eup %2250 }
 0x583   : > { %v1170_v34 = vpop.xlane.xlu1 %1169 }
 0x584   : > { %2256 = vrcp.f32 %v1170_v34 }
 0x586   : > { %v2253_v37 = vpop.eup %2252 }
 0x587   : > { %v1173_v41 = vpop.xlane.xlu1 %1172 }
 0x588   : > { %2258 = vrcp.f32 %v1173_v41 }
 0x58a   : > { %v1176_v40 = vpop.xlane.xlu0 %1175  ;;  %v2255_v45 = vpop.eup %2254 }
 0x58b   : > { %2260 = vrcp.f32 %v1176_v40 }
 0x59f   : > { %v1827_v51 = vpop.f32.mrb[16].mxu0 }
 0x5a0   : > { %v1828_v18 = vpop.f32.mrb[17].mxu0 }
 0x5a1   : > { %v1829_v19 = vadd.f32 %v1828_v18, %v1827_v51  ;;  %v1830_v46 = vpop.f32.mrb[18].mxu0 }
 0x5a2   : > { %v1831_v47 = vpop.f32.mrb[19].mxu0 }
 0x5a3   : > { %v1328_v61 = vmul.f32 %v2235_v55, %v1829_v19  ;;  %v1832_v63 = vadd.f32 %v1831_v47, %v1830_v46  ;;  %v2257_v19 = vpop.eup %2256  ;;  %v1179_v46 = vpop.xlane.xlu1 %1178 }
 0x5a4   : > { %v1182_v47 = vpop.xlane.xlu0 %1181  ;;  %2262 = vrcp.f32 %v1179_v46 }
 0x5a5   : > { %v1329_v1 = vmul.f32 %v2237_v0, %v1832_v63  ;;  %1946 = vmatprep.mubr.msk.f32.mxu0 %vm655_vm5, %v1328_v61  ;;  %2264 = vrcp.f32 %v1182_v47 }
 0x5a7   : > { %1947 = vmatmul.mubr.msk.f32.vlgmr.msra.gmra.mrb[48].mxu0 %vm655_vm5, %v1329_v1  ;;  %v2259_v1 = vpop.eup %2258 }
 0x5a9   : > { %v1833_v50 = vpop.f32.mrb[20].mxu0 }
 0x5aa   : > { %v1834_v2 = vpop.f32.mrb[21].mxu0 }
 0x5ab   : > { %v1835_v20 = vadd.f32 %v1834_v2, %v1833_v50  ;;  %v1836_v3 = vpop.f32.mrb[22].mxu0 }
 0x5ac   : > { %v1837_v4 = vpop.f32.mrb[23].mxu0 }
 0x5ad   : > { %v1330_v52 = vmul.f32 %v2239_v23, %v1835_v20  ;;  %v1838_v53 = vadd.f32 %v1837_v4, %v1836_v3  ;;  %v2261_v20 = vpop.eup %2260 }
 0x5af   : > { %v1331_v11 = vmul.f32 %v2241_v5, %v1838_v53  ;;  %1949 = vmatprep.mubr.msk.f32.mxu0 %vm655_vm5, %v1330_v52  ;;  %v2263_v5 = vpop.eup %2262 }
 0x5b1   : > { %v1839_v15 = vpop.f32.mrb[24].mxu0  ;;  %1950 = vmatmul.mubr.msk.f32.gmra.mrb[50].mxu0 %vm655_vm5, %v1331_v11 }
 0x5b2   : > { %v1840_v17 = vpop.f32.mrb[25].mxu0 }
 0x5b3   : > { %v1841_v28 = vadd.f32 %v1840_v17, %v1839_v15  ;;  %v1842_v21 = vpop.f32.mrb[26].mxu0  ;;  %v2265_v17 = vpop.eup %2264 }
 0x5b4   : > { %v1843_v22 = vpop.f32.mrb[27].mxu0 }
 0x5b5   : > { %v1332_v54 = vmul.f32 %v2243_v29, %v1841_v28  ;;  %v1844_v56 = vadd.f32 %v1843_v22, %v1842_v21  ;;  %v1729_v21 = vld [vmem:[%s2943_s4] ss:$0 sm:$0xff] }
 0x5b7   : > { %v1333_v7 = vmul.f32 %v2245_v24, %v1844_v56  ;;  %1952 = vmatprep.mubr.msk.f32.mxu0 %vm655_vm5, %v1332_v54 }
 0x5b9   : > { %v1845_v25 = vpop.f32.mrb[28].mxu0  ;;  %1953 = vmatmul.mubr.msk.f32.gmra.mrb[52].mxu0 %vm655_vm5, %v1333_v7 }
 0x5ba   : > { %v1846_v30 = vpop.f32.mrb[29].mxu0 }
 0x5bb   : > { %v1847_v26 = vadd.f32 %v1846_v30, %v1845_v25  ;;  %v1848_v8 = vpop.f32.mrb[30].mxu0 }
 0x5bc   : > { %v1849_v58 = vpop.f32.mrb[31].mxu0 }
 0x5bd   : > { %v1334_v27 = vmul.f32 %v2247_v10, %v1847_v26  ;;  %v1850_v59 = vadd.f32 %v1849_v58, %v1848_v8 }
 0x5bf   : > { %v1335_v32 = vmul.f32 %v2249_v31, %v1850_v59  ;;  %1955 = vmatprep.mubr.msk.f32.mxu0 %vm655_vm5, %v1334_v27 }
 0x5c1   : > { %v1851_v35 = vpop.f32.mrb[32].mxu0  ;;  %1956 = vmatmul.mubr.msk.f32.gmra.mrb[54].mxu0 %vm655_vm5, %v1335_v32 }
 0x5c2   : > { %v1852_v38 = vpop.f32.mrb[33].mxu0 }
 0x5c3   : > { %v1853_v60 = vadd.f32 %v1852_v38, %v1851_v35  ;;  %v1854_v12 = vpop.f32.mrb[34].mxu0 }
 0x5c4   : > { %v1855_v39 = vpop.f32.mrb[35].mxu0 }
 0x5c5   : > { %v1336_v13 = vmul.f32 %v2251_v62, %v1853_v60  ;;  %v1856_v36 = vadd.f32 %v1855_v39, %v1854_v12 }
 0x5c7   : > { %v1337_v42 = vmul.f32 %v2253_v37, %v1856_v36  ;;  %1958 = vmatprep.mubr.msk.f32.mxu0 %vm655_vm5, %v1336_v13 }
 0x5c9   : > { %v1857_v43 = vpop.f32.mrb[36].mxu0  ;;  %1959 = vmatmul.mubr.msk.f32.gmra.mrb[56].mxu0 %vm655_vm5, %v1337_v42 }
 0x5ca   : > { %v1858_v14 = vpop.f32.mrb[37].mxu0 }
 0x5cb   : > { %v1859_v16 = vadd.f32 %v1858_v14, %v1857_v43  ;;  %v1860_v44 = vpop.f32.mrb[38].mxu0 }
 0x5cc   : > { %v1861_v49 = vpop.f32.mrb[39].mxu0 }
 0x5cd   : > { %v1338_v51 = vmul.f32 %v2255_v45, %v1859_v16  ;;  %v1862_v18 = vadd.f32 %v1861_v49, %v1860_v44  ;;  %v2266_v16 = vld [vmem:[%s2669_s13] sm:$0xf]  ;;  %s2422_s13 = smov [#allocation7]  }
 0x5ce   : > { %s2301_s10 = sshll.u32 %s2422_s13, 4  ;;  %s2302_s10 = int_to_ptr.vmem [resolvable:$false] %s2301_s10 }
 0x5cf   : > { %v1339_v55 = vmul.f32 %v2257_v19, %v1862_v18  ;;  %1961 = vmatprep.mubr.msk.f32.mxu0 %vm655_vm5, %v1338_v51  ;;  %s2303_s14 = scalar_lea.vmem %s2302_s10, 128  ;;  %p2304_p1 = scmp.lt.s32.totalorder %s2875_s7, %s2302_s10 }
 0x5d0   : > { %p2305_p8 = scmp.lt.s32.totalorder %s2303_s14, %s2297_s25 }
 0x5d1   : > { %v1863_v57 = vpop.f32.mrb[40].mxu0  ;;  %1962 = vmatmul.mubr.msk.f32.gmra.mrb[58].mxu0 %vm655_vm5, %v1339_v55 }
 0x5d2   : > { %v1864_v61 = vpop.f32.mrb[41].mxu0  ;;  %p2306_p10 = por %p2305_p8, %p2304_p1 }
 0x5d3   : > { %v1865_v63 = vadd.f32 %v1864_v61, %v1863_v57  ;;  %v1866_v0 = vpop.f32.mrb[42].mxu0 }
 0x5d4   : > { %v1867_v48 = vpop.f32.mrb[43].mxu0  ;;  %p2307_p3 = pnand %p2306_p10, %p2300_p11 }
 0x5d5   : > { %v1340_v50 = vmul.f32 %v2259_v1, %v1865_v63  ;;  %v1868_v2 = vadd.f32 %v1867_v48, %v1866_v0 }
 0x5d7   : > { %v1341_v3 = vmul.f32 %v2261_v20, %v1868_v2  ;;  %1964 = vmatprep.mubr.msk.f32.mxu0 %vm655_vm5, %v1340_v50 }
 0x5d9   : > { %v1869_v23 = vpop.f32.mrb[44].mxu0  ;;  %1965 = vmatmul.mubr.msk.f32.gmra.mrb[60].mxu0 %vm655_vm5, %v1341_v3 }
 0x5da   : > { %v1870_v4 = vpop.f32.mrb[45].mxu0 }
 0x5db   : > { %v1871_v52 = vadd.f32 %v1870_v4, %v1869_v23  ;;  %v1872_v53 = vpop.f32.mrb[46].mxu0 }
 0x5dc   : > { %v1873_v9 = vpop.f32.mrb[47].mxu0 }
 0x5dd   : > { %v1342_v11 = vmul.f32 %v2263_v5, %v1871_v52  ;;  %v1874_v15 = vadd.f32 %v1873_v9, %v1872_v53 }
 0x5df   : > { %v1343_v28 = vmul.f32 %v2265_v17, %v1874_v15  ;;  %1967 = vmatprep.mubr.msk.f32.mxu0 %vm655_vm5, %v1342_v11 }
 0x5e1   : > { %1968 = vmatmul.mubr.msk.f32.gmra.mrb[62].mxu0 %vm655_vm5, %v1343_v28 }
 0x67a   : > { %v1948_v29 = vpop.f32.mrb[48].mxu0 }
 0x67b   : > { %v1470_v22 = vpop.f32.mrb[49].mxu0  ;;  %v1476_v54 = vadd.f32 %v1948_v29, %v1729_v21 }
 0x67c   : > { %v1471_v6 = vadd.f32 %v1729_v21, %v1470_v22 }
 0x67e   : > { %1549 = vxpose.xlu1.b32.start [1/16] (narrow) %v1471_v6, 8 }
 0x682   : > { %1550 = vxpose.xlu1.b32.cont [2/16] (narrow) %v1476_v54, 8 }
 0x684   : > { %v1951_v56 = vpop.f32.mrb[50].mxu0 }
 0x685   : > { %v1480_v24 = vpop.f32.mrb[51].mxu0  ;;  %v1486_v25 = vadd.f32 %v1951_v56, %v1729_v21 }
 0x686   : > { %v1481_v7 = vadd.f32 %v1729_v21, %v1480_v24 }
 0x688   : > { %1551 = vxpose.xlu1.b32.cont [3/16] (narrow) %v1481_v7, 8 }
 0x68c   : > { %1552 = vxpose.xlu1.b32.cont [4/16] (narrow) %v1486_v25, 8  ;;  %v1954_v30 = vpop.f32.mrb[52].mxu0 }
 0x68d   : > { %v1490_v33 = vpop.f32.mrb[53].mxu0  ;;  %v1496_v8 = vadd.f32 %v1954_v30, %v1729_v21 }
 0x68e   : > { %v1491_v26 = vadd.f32 %v1729_v21, %v1490_v33 }
 0x690   : > { %1553 = vxpose.xlu1.b32.cont [5/16] (narrow) %v1491_v26, 8 }
 0x694   : > { %1554 = vxpose.xlu1.b32.cont [6/16] (narrow) %v1496_v8, 8  ;;  %v1957_v10 = vpop.f32.mrb[54].mxu0 }
 0x695   : > { %v1500_v58 = vpop.f32.mrb[55].mxu0  ;;  %v1506_v59 = vadd.f32 %v1957_v10, %v1729_v21 }
 0x696   : > { %v1501_v27 = vadd.f32 %v1729_v21, %v1500_v58 }
 0x698   : > { %1555 = vxpose.xlu1.b32.cont [7/16] (narrow) %v1501_v27, 8 }
 0x69c   : > { %1556 = vxpose.xlu1.b32.cont [8/16] (narrow) %v1506_v59, 8  ;;  %v1960_v31 = vpop.f32.mrb[56].mxu0 }
 0x69d   : > { %v1510_v32 = vpop.f32.mrb[57].mxu0  ;;  %v1516_v35 = vadd.f32 %v1960_v31, %v1729_v21 }
 0x69e   : > { %v1511_v34 = vadd.f32 %v1729_v21, %v1510_v32 }
 0x6a0   : > { %1557 = vxpose.xlu1.b32.cont [9/16] (narrow) %v1511_v34, 8 }
 0x6a4   : > { %1558 = vxpose.xlu1.b32.cont [10/16] (narrow) %v1516_v35, 8  ;;  %v1963_v38 = vpop.f32.mrb[58].mxu0 }
 0x6a5   : > { %v1520_v60 = vpop.f32.mrb[59].mxu0  ;;  %v1526_v62 = vadd.f32 %v1963_v38, %v1729_v21 }
 0x6a6   : > { %v1521_v12 = vadd.f32 %v1729_v21, %v1520_v60 }
 0x6a8   : > { %1559 = vxpose.xlu1.b32.cont [11/16] (narrow) %v1521_v12, 8 }
 0x6ac   : > { %1560 = vxpose.xlu1.b32.cont [12/16] (narrow) %v1526_v62, 8  ;;  %v1966_v39 = vpop.f32.mrb[60].mxu0 }
 0x6ad   : > { %v1530_v13 = vpop.f32.mrb[61].mxu0  ;;  %v1536_v37 = vadd.f32 %v1966_v39, %v1729_v21 }
 0x6ae   : > { %v1531_v36 = vadd.f32 %v1729_v21, %v1530_v13 }
 0x6b0   : > { %1561 = vxpose.xlu1.b32.cont [13/16] (narrow) %v1531_v36, 8 }
 0x6b4   : > { %1562 = vxpose.xlu1.b32.cont [14/16] (narrow) %v1536_v37, 8  ;;  %v1969_v41 = vpop.f32.mrb[62].mxu0 }
 0x6b5   : > { %v1540_v42 = vpop.f32.mrb[63].mxu0  ;;  %v1546_v43 = vadd.f32 %v1969_v41, %v1729_v21 }
 0x6b6   : > { %v1541_v40 = vadd.f32 %v1729_v21, %v1540_v42 }
 0x6b8   : > { %1563 = vxpose.xlu1.b32.cont [15/16] (narrow) %v1541_v40, 8 }
 0x6bc   : > { %1564 = vxpose.xlu1.b32.end [16/16] (narrow) %v1546_v43, 8 }
 0x700   : > { %v1565_v14 = vpop.trf.xlu1 }
 0x701   : > { %v1581_v44 = vadd.f32 %v2266_v16, %v1565_v14 }
 0x703   : > { %1582 = vst [vmem:[%s254_s30] sm:$0xf] %v1581_v44 }
 0x704   : > { %2310 = shalt.err (!%p2307_p3)
}
 0x705   : > { %s2311_s6 = scalar_lea.hbm %s2873_s12, 64  ;;  %s2315_s27 = scalar_lea.hbm %s2944_s5, 256 }
 0x706   : > { %p2312_p13 = scmp.ne.s32.totalorder %s2873_s12, %s2311_s6  ;;  %p2316_p6 = scmp.lt.u32.totalorder %s2873_s12, %s2944_s5 }
 0x707   : > { %p2317_p9 = scmp.lt.u32.totalorder %s2315_s27, %s2311_s6  ;;  %p2319_p7 = scmp.lt.u32.totalorder %s2311_s6, %s2873_s12 }
 0x708   : > { %p2313_p0 = pnand %p2312_p13, %p2959_p2 }
 0x709   : > { %p2318_p12 = por %p2317_p9, %p2316_p6 }
 0x70a   : > { %p2314_p5 = pneg %p2313_p0 }
 0x70b   : > { %p2320_p4 = por %p2319_p7, %p2318_p12 }
 0x70d   : > { %p2321_p11 = pnand %p2320_p4, %p2314_p5 }
 0x70f   : > { %2324 = shalt.err (!%p2321_p11)
}
 0x710   : > { %1985 = dma.vmem_to_hbm [thread:$0]  (%p2959_p2), %s2875_s7, 64, %s2873_s12, %s1584_s24  }
 0x711 PF: > { %p1996_p1 = scmp.ge.s32.totalorder %s2419_s28, 2  ;;  %s1611_s29 = sand.u32 1, %s2379_s18  }
 0x712   : > { %p2960_p8 = scmp.ne.s32.totalorder %s2955_s21, 0  ;;  %s1612_s25 = scalar_lea.sflag [#allocation6], %s1611_s29 }
 0x714   : > { %p1992_p10 = pnand %p1996_p1, %p2960_p8 }
 0x716   : > { %2374 = dma.done.wait (!%p1992_p10), %s1612_s25, 64  }
 0x717   : > { %2376 = vsyncadd (!%p1992_p10), %s1612_s25, 4294967232  ;;  %s21_s28 = sadd.s32 1, %s2419_s28   ;;  %s2961_s25 = sld [smem:[#allocation10_spill]] }
 0x718   : > { %p18_p3 = scmp.ge.s32.totalorder %s21_s28, 6   ;;  %s2962_s15 = sld [smem:[#allocation11_spill]] }
 0x719   : > { %s2963_s27 = sld [smem:[#allocation12_spill]]  ;;  %s2964_s18 = smov %s2383_s19 }
 0x71a   : > { %s2965_s19 = smov %s2387_s20  ;;  %s2966_s20 = smov %s2543_s17 }
 0x71b   : > { %s2967_s21 = smov %s2395_s22  ;;  %s2968_s22 = smov %s2399_s23 }
 0x71c   : > { %s2969_s23 = smov %s2540_s16  ;;  %s2970_s24 = smov %s2411_s26 }
 0x71d   :  { %20 = sbr.rel (!%p18_p3) target bundleno = 9 (0x9), region = 90 }
 0x71e   : > { %s2971_s26 = smov %s2962_s15 }
 0x724   :  { %1617 = vsyncpa [#allocation5], 1 }
 0x725   :  { %1619 = vsyncpa [#allocation5 + $0x1], 1 }
 0x726   :  { %1620 = vsyncpa [#allocation6], 1 }
 0x727   :  { %1622 = vsyncpa [#allocation6 + $0x1], 1 }

</bundles_post_ra>
